<compile_context>
chip_gen: v7x
topology: tpu7x:2x2x1
jax: 0.10.0
libtpu: 0.0.40
codegen_flags: <defaults>
</compile_context>

<pallas_src>
import numpy as np
import jax
import jax.numpy as jnp
from jax.experimental import pallas as pl
from jax.experimental.pallas import tpu as pltpu


# ----------------------------------------------------------------------------
# Fused kernel: relative geometry -> sinusoidal embedding -> linear(64->1)
#   -> ReLU -> softmax(gt axis) -> (p @ feats) @ W2^T + b2
# ----------------------------------------------------------------------------
def _geometry_fused_kernel(scale_ref, b1_ref,          # SMEM: (n_freq,), (1,)
                           amp_ref, phase_ref,          # VMEM resident: (n_freq, 4N)
                           xywh_ref, xywht_ref,         # (TB, N, 4), (TB, 4, N) f32
                           feats_ref,                   # (TB, N, Cin) bf16
                           w2t_ref, b2_ref,             # (Cin, Dout) bf16, (1, Dout) f32
                           out_ref):                    # (TB, N, Dout) f32
    tb_per_step, n, _ = xywh_ref.shape
    n_freq = scale_ref.shape[0]

    w2t = w2t_ref[...]          # resident MXU weight, loaded once per grid step
    b2 = b2_ref[...]

    for tb in range(tb_per_step):
        roi = xywh_ref[tb]      # (N, 4)  [cx, cy, w, h], roi index on sublanes
        gt = xywht_ref[tb]      # (4, N)  same boxes (gt == rois), gt index on lanes

        roi_cx, roi_cy = roi[:, 0:1], roi[:, 1:2]
        roi_w, roi_h = roi[:, 2:3], roi[:, 3:4]
        gt_cx, gt_cy = gt[0:1, :], gt[1:2, :]
        inv_gw = 1.0 / jnp.maximum(gt[2:3, :], 0.001)   # small (1, N) divisions
        inv_gh = 1.0 / jnp.maximum(gt[3:4, :], 0.001)

        # Lane-packed (N, 4N) relative geometry: [rel_x | rel_y | rel_w | rel_h].
        rel = jnp.concatenate(
            [jnp.abs(gt_cx - roi_cx) * inv_gw,
             jnp.abs(gt_cy - roi_cy) * inv_gh,
             roi_w * inv_gw,
             roi_h * inv_gh], axis=-1)
        g = jnp.log(jnp.maximum(rel, 0.001))             # (N, 4N)

        # Embedding + linear(embd_dim -> 1) folded via the amplitude/phase
        # identity: w_sin*sin(d) + w_cos*cos(d) == amp * sin(d + phase).
        # Independent partial accumulators keep EUP pushes back-to-back.
        n_parts = min(4, n_freq)
        parts = [amp_ref[k:k + 1, :]
                 * jnp.sin(g * scale_ref[k] + phase_ref[k:k + 1, :])
                 for k in range(n_parts)]
        for k in range(n_parts, n_freq):
            idx = k % n_parts
            parts[idx] = parts[idx] + amp_ref[k:k + 1, :] * jnp.sin(
                g * scale_ref[k] + phase_ref[k:k + 1, :])
        if n_parts == 4:
            acc = (parts[0] + parts[1]) + (parts[2] + parts[3])
        elif n_parts == 3:
            acc = (parts[0] + parts[1]) + parts[2]
        elif n_parts == 2:
            acc = parts[0] + parts[1]
        else:
            acc = parts[0]

        # Fold the 4 component blocks back into an (N, N) logit map.
        logits = (acc[:, 0:n] + acc[:, n:2 * n]
                  + acc[:, 2 * n:3 * n] + acc[:, 3 * n:4 * n] + b1_ref[0])
        logits = jnp.maximum(logits, 0.0)                # ReLU
        m = jnp.max(logits, axis=-1, keepdims=True)
        e = jnp.exp(logits - m)
        p = e * pl.reciprocal(jnp.sum(e, axis=-1, keepdims=True), approx=True)
        # TODO(synk): dropout is identity here (drop_rate=0.0 default / eval mode);
        #             the (p @ X) @ W2^T reordering relies on it.

        pf = jnp.dot(p.astype(jnp.bfloat16), feats_ref[tb],
                     preferred_element_type=jnp.float32)          # (N, Cin)
        out_ref[tb] = (jnp.dot(pf.astype(jnp.bfloat16), w2t,
                               preferred_element_type=jnp.float32)
                       + b2).astype(out_ref.dtype)                # (N, Dout)


def geometry_relation(xywh, xywh_t, feats_b, amp_lanes, phase_lanes,
                      scale, b1, w2t_bf16, b2_2d, batches_per_step):
    B, N, _ = xywh.shape
    Cin = feats_b.shape[-1]
    Dout = w2t_bf16.shape[-1]
    n_freq = scale.shape[0]
    TB = batches_per_step
    assert B % TB == 0

    smem_spec = pl.BlockSpec(memory_space=pltpu.MemorySpace.SMEM)

    out = pl.pallas_call(
        _geometry_fused_kernel,
        out_shape=jax.ShapeDtypeStruct((B, N, Dout), jnp.float32),
        grid=(B // TB,),
        in_specs=[
            smem_spec,                                          # scale   (n_freq,)
            smem_spec,                                          # b1      (1,)
            pl.BlockSpec((n_freq, 4 * N), lambda i: (0, 0)),    # amp_lanes (resident)
            pl.BlockSpec((n_freq, 4 * N), lambda i: (0, 0)),    # phase_lanes (resident)
            pl.BlockSpec((TB, N, 4), lambda i: (i, 0, 0)),      # xywh
            pl.BlockSpec((TB, 4, N), lambda i: (i, 0, 0)),      # xywh_t
            pl.BlockSpec((TB, N, Cin), lambda i: (i, 0, 0)),    # feats (bf16)
            pl.BlockSpec((Cin, Dout), lambda i: (0, 0)),        # W2^T (bf16, resident)
            pl.BlockSpec((1, Dout), lambda i: (0, 0)),          # b2
        ],
        out_specs=pl.BlockSpec((TB, N, Dout), lambda i: (i, 0, 0)),
        compiler_params=pltpu.CompilerParams(
            dimension_semantics=("parallel",)),
    )(scale, b1, amp_lanes, phase_lanes, xywh, xywh_t, feats_b, w2t_bf16, b2_2d)
    return out.reshape(B * N, Dout)


# ----------------------------------------------------------------------------
# Parameter preparation + module wrapper (glue in plain JAX)
# ----------------------------------------------------------------------------
def make_params(w1, b1, w2, b2, embd_dim, wave_length):
    n_freq = embd_dim // 8
    feat_range = jnp.arange(n_freq, dtype=jnp.float32)
    dim_mat = jnp.power(jnp.float32(wave_length), (8.0 / embd_dim) * feat_range)
    # embedding flatten order is (component c, frequency k, {sin, cos})
    w1_r = jnp.reshape(w1, (4, n_freq, 2)).astype(jnp.float32)
    w_sin, w_cos = w1_r[..., 0], w1_r[..., 1]
    return {
        "scale": (100.0 / dim_mat).astype(jnp.float32),          # (n_freq,)
        "amp": jnp.sqrt(w_sin * w_sin + w_cos * w_cos),          # (4, n_freq)
        "phase": jnp.arctan2(w_cos, w_sin),                      # (4, n_freq)
        "b1": b1.astype(jnp.float32),
        "w2_t": jnp.transpose(w2).astype(jnp.bfloat16),          # (Cin, Dout) MXU operand
        "b2": b2.astype(jnp.float32),
    }


def geometry_relation_aware_forward(rois, gt_bbox_feats, batch_num, params,
                                    batches_per_step=None):
    B = batch_num
    n = rois.shape[1]

    if batches_per_step is None:
        # Amortize per-grid-step overhead but keep >=2 steps for megacore/v7x.
        batches_per_step = 1
        for tb in range(min(8, B // 2), 0, -1):
            if B % tb == 0:
                batches_per_step = tb
                break

    rois_flat = rois.reshape(-1, 4).astype(jnp.float32)
    cx = (rois_flat[:, 0] + rois_flat[:, 2]) * 0.5
    cy = (rois_flat[:, 1] + rois_flat[:, 3]) * 0.5
    w = rois_flat[:, 2] - rois_flat[:, 0]
    h = rois_flat[:, 3] - rois_flat[:, 1]
    xywh = jnp.stack([cx, cy, w, h], axis=-1).reshape(B, n, 4)
    xywh_t = jnp.transpose(xywh, (0, 2, 1))

    # gt_bbox_feats.view(m, -1), grouped per batch, bf16 MXU operand.
    feats_b = gt_bbox_feats.reshape(B, n, -1).astype(jnp.bfloat16)

    # Lane-packed per-frequency amplitude / phase rows matching [x|y|w|h] packing:
    # amp_lanes[k, c*n + j] = amp[c, k]
    amp_lanes = jnp.repeat(jnp.transpose(params["amp"]), n, axis=1)      # (n_freq, 4n)
    phase_lanes = jnp.repeat(jnp.transpose(params["phase"]), n, axis=1)  # (n_freq, 4n)
    b2_2d = params["b2"].reshape(1, -1)

    return geometry_relation(xywh, xywh_t, feats_b, amp_lanes, phase_lanes,
                             params["scale"], params["b1"],
                             params["w2_t"], b2_2d, batches_per_step)


# ----------------------------------------------------------------------------
# Pure-numpy reference (mirrors the PyTorch forward, f32)
# ----------------------------------------------------------------------------
def _reference(rois, gt_bbox_feats, B, w1, b1, w2, b2, embd_dim, wave_length,
               topo_out_dim):
    rois = np.asarray(rois, np.float32).reshape(-1, 4)
    n = rois.shape[0] // B
    cx = (rois[:, 0] + rois[:, 2]) / 2.0
    cy = (rois[:, 1] + rois[:, 3]) / 2.0
    w = rois[:, 2] - rois[:, 0]
    h = rois[:, 3] - rois[:, 1]
    xywh = np.stack([cx, cy, w, h], axis=-1)
    feats = np.asarray(gt_bbox_feats, np.float32).reshape(B * n, -1)
    feats_trans = feats @ np.asarray(w2, np.float32).T + np.asarray(b2, np.float32)
    n_freq = embd_dim // 8
    dim_mat = np.power(wave_length,
                       (8.0 / embd_dim) * np.arange(n_freq, dtype=np.float32))
    w1v = np.asarray(w1, np.float32)[0]
    b1v = float(np.asarray(b1)[0])
    out = np.zeros((B * n, topo_out_dim), np.float32)
    for i in range(B):
        sl = slice(i * n, (i + 1) * n)
        r = xywh[sl]
        g = r  # gt_rois == rois in the module
        gw = np.maximum(g[:, 2], 0.001)
        gh = np.maximum(g[:, 3], 0.001)
        rel_x = np.maximum(np.abs(g[None, :, 0] - r[:, 0:1]) / gw[None, :], 0.001)
        rel_y = np.maximum(np.abs(g[None, :, 1] - r[:, 1:2]) / gh[None, :], 0.001)
        rel_w = np.maximum(r[:, 2:3] / gw[None, :], 0.001)
        rel_h = np.maximum(r[:, 3:4] / gh[None, :], 0.001)
        geo = np.log(np.stack([rel_x, rel_y, rel_w, rel_h], axis=-1))     # (n,n,4)
        div = (100.0 * geo)[..., None] / dim_mat                          # (n,n,4,f)
        emb = np.stack([np.sin(div), np.cos(div)], axis=-1).reshape(n, n, embd_dim)
        logits = np.maximum(emb @ w1v + b1v, 0.0)
        e = np.exp(logits - logits.max(-1, keepdims=True))
        p = e / e.sum(-1, keepdims=True)
        out[sl] = p @ feats_trans[sl]
    return out


if __name__ == "__main__":
    B, n = 2, 8
    C, Wd, Hd = 4, 4, 4
    topo_in_dim = C * Wd * Hd
    topo_out_dim = 256
    embd_dim = 64
    wave_length = 1000.0

    key = jax.random.PRNGKey(0)
    k_xy, k_wh, k_feats, k_w1, k_w2 = jax.random.split(key, 5)

    xy = jax.random.uniform(k_xy, (B, n, 2), jnp.float32, 0.0, 20.0)
    wh = jax.random.uniform(k_wh, (B, n, 2), jnp.float32, 2.0, 10.0)
    rois = jnp.concatenate([xy, xy + wh], axis=-1)                 # (B, n, 4)

    gt_bbox_feats = jax.random.normal(k_feats, (B * n, C, Wd, Hd), jnp.float32)

    # deterministic parameter init (same scheme as the module's init_weight)
    w1 = 0.01 * jax.random.normal(k_w1, (1, embd_dim), jnp.float32)
    b1 = jnp.zeros((1,), jnp.float32)
    w2 = 0.01 * jax.random.normal(k_w2, (topo_out_dim, topo_in_dim), jnp.float32)
    b2 = jnp.zeros((topo_out_dim,), jnp.float32)

    params = make_params(w1, b1, w2, b2, embd_dim, wave_length)

    out = geometry_relation_aware_forward(rois, gt_bbox_feats, B, params)
    out = jax.block_until_ready(out)

    ref = _reference(rois, gt_bbox_feats, B, w1, b1, w2, b2,
                     embd_dim, wave_length, topo_out_dim)
    assert out.shape == (B * n, topo_out_dim), out.shape
    assert np.allclose(np.asarray(out), ref, rtol=1e-2, atol=1e-3), \
        f"max abs err = {np.max(np.abs(np.asarray(out) - ref))}"

    print("KERNEL_OK")
</pallas_src>

<mosaic_0001>
module attributes {stable_mosaic.version = 11 : i64} {
  func.func @_geometry_fused_kernel(%arg0: i32, %arg1: memref<8xf32, #tpu.memory_space<smem>>, %arg2: memref<1xf32, #tpu.memory_space<smem>>, %arg3: memref<8x32xf32, #tpu.memory_space<vmem>>, %arg4: memref<8x32xf32, #tpu.memory_space<vmem>>, %arg5: memref<1x8x4xf32, #tpu.memory_space<vmem>>, %arg6: memref<1x4x8xf32, #tpu.memory_space<vmem>>, %arg7: memref<1x8x64xbf16, #tpu.memory_space<vmem>>, %arg8: memref<64x256xbf16, #tpu.memory_space<vmem>>, %arg9: memref<1x256xf32, #tpu.memory_space<vmem>>, %arg10: memref<1x8x256xf32, #tpu.memory_space<vmem>>) attributes {dimension_semantics = [#tpu.dimension_semantics<parallel>], iteration_bounds = array<i64: 2>, scalar_prefetch = 0 : i64, scratch_operands = 0 : i64, tpu.core_type = #tpu.core_type<tc>, window_params = [{transform_indices = @transform_0, window_bounds = array<i64: 8>}, {transform_indices = @transform_1, window_bounds = array<i64: 1>}, {pipeline_mode = #tpu.pipeline_mode<synchronous>, transform_indices = @transform_2, window_bounds = array<i64: 8, 32>}, {pipeline_mode = #tpu.pipeline_mode<synchronous>, transform_indices = @transform_3, window_bounds = array<i64: 8, 32>}, {transform_indices = @transform_4, window_bounds = array<i64: 1, 8, 4>}, {transform_indices = @transform_5, window_bounds = array<i64: 1, 4, 8>}, {transform_indices = @transform_6, window_bounds = array<i64: 1, 8, 64>}, {pipeline_mode = #tpu.pipeline_mode<synchronous>, transform_indices = @transform_7, window_bounds = array<i64: 64, 256>}, {pipeline_mode = #tpu.pipeline_mode<synchronous>, transform_indices = @transform_8, window_bounds = array<i64: 1, 256>}, {transform_indices = @transform_9, window_bounds = array<i64: 1, 8, 256>}]} {
    %c0 = arith.constant 0 : index
    %c0_0 = arith.constant 0 : index
    %0 = vector.load %arg8[%c0, %c0_0] : memref<64x256xbf16, #tpu.memory_space<vmem>>, vector<64x256xbf16>
    %c0_1 = arith.constant 0 : index
    %c0_2 = arith.constant 0 : index
    %1 = vector.load %arg9[%c0_1, %c0_2] : memref<1x256xf32, #tpu.memory_space<vmem>>, vector<1x256xf32>
    %c0_3 = arith.constant 0 : index
    %c0_4 = arith.constant 0 : index
    %c0_5 = arith.constant 0 : index
    %2 = vector.load %arg5[%c0_3, %c0_4, %c0_5] : memref<1x8x4xf32, #tpu.memory_space<vmem>>, vector<1x8x4xf32>
    %3 = vector.shape_cast %2 : vector<1x8x4xf32> to vector<8x4xf32>
    %c0_6 = arith.constant 0 : index
    %c0_7 = arith.constant 0 : index
    %c0_8 = arith.constant 0 : index
    %4 = vector.load %arg6[%c0_6, %c0_7, %c0_8] : memref<1x4x8xf32, #tpu.memory_space<vmem>>, vector<1x4x8xf32>
    %5 = vector.shape_cast %4 : vector<1x4x8xf32> to vector<4x8xf32>
    %6 = vector.extract_strided_slice %3 {offsets = [0, 0], sizes = [8, 1], strides = [1, 1]} : vector<8x4xf32> to vector<8x1xf32>
    %7 = vector.extract_strided_slice %3 {offsets = [0, 1], sizes = [8, 1], strides = [1, 1]} : vector<8x4xf32> to vector<8x1xf32>
    %8 = vector.extract_strided_slice %3 {offsets = [0, 2], sizes = [8, 1], strides = [1, 1]} : vector<8x4xf32> to vector<8x1xf32>
    %9 = vector.extract_strided_slice %3 {offsets = [0, 3], sizes = [8, 1], strides = [1, 1]} : vector<8x4xf32> to vector<8x1xf32>
    %10 = vector.extract_strided_slice %5 {offsets = [0, 0], sizes = [1, 8], strides = [1, 1]} : vector<4x8xf32> to vector<1x8xf32>
    %11 = vector.extract_strided_slice %5 {offsets = [1, 0], sizes = [1, 8], strides = [1, 1]} : vector<4x8xf32> to vector<1x8xf32>
    %12 = vector.extract_strided_slice %5 {offsets = [2, 0], sizes = [1, 8], strides = [1, 1]} : vector<4x8xf32> to vector<1x8xf32>
    %cst = arith.constant 1.000000e-03 : f32
    %13 = vector.broadcast %cst : f32 to vector<1x8xf32>
    %14 = arith.maximumf %12, %13 : vector<1x8xf32>
    %cst_9 = arith.constant 1.000000e+00 : f32
    %15 = vector.broadcast %cst_9 : f32 to vector<1x8xf32>
    %16 = arith.divf %15, %14 : vector<1x8xf32>
    %17 = vector.extract_strided_slice %5 {offsets = [3, 0], sizes = [1, 8], strides = [1, 1]} : vector<4x8xf32> to vector<1x8xf32>
    %cst_10 = arith.constant 1.000000e-03 : f32
    %18 = vector.broadcast %cst_10 : f32 to vector<1x8xf32>
    %19 = arith.maximumf %17, %18 : vector<1x8xf32>
    %cst_11 = arith.constant 1.000000e+00 : f32
    %20 = vector.broadcast %cst_11 : f32 to vector<1x8xf32>
    %21 = arith.divf %20, %19 : vector<1x8xf32>
    %22 = vector.broadcast %10 : vector<1x8xf32> to vector<8x8xf32>
    %23 = vector.broadcast %6 : vector<8x1xf32> to vector<8x8xf32>
    %24 = arith.subf %22, %23 : vector<8x8xf32>
    %25 = math.absf %24 : vector<8x8xf32>
    %26 = vector.broadcast %16 : vector<1x8xf32> to vector<8x8xf32>
    %27 = arith.mulf %25, %26 : vector<8x8xf32>
    %28 = vector.broadcast %11 : vector<1x8xf32> to vector<8x8xf32>
    %29 = vector.broadcast %7 : vector<8x1xf32> to vector<8x8xf32>
    %30 = arith.subf %28, %29 : vector<8x8xf32>
    %31 = math.absf %30 : vector<8x8xf32>
    %32 = vector.broadcast %21 : vector<1x8xf32> to vector<8x8xf32>
    %33 = arith.mulf %31, %32 : vector<8x8xf32>
    %34 = vector.broadcast %8 : vector<8x1xf32> to vector<8x8xf32>
    %35 = vector.broadcast %16 : vector<1x8xf32> to vector<8x8xf32>
    %36 = arith.mulf %34, %35 : vector<8x8xf32>
    %37 = vector.broadcast %9 : vector<8x1xf32> to vector<8x8xf32>
    %38 = vector.broadcast %21 : vector<1x8xf32> to vector<8x8xf32>
    %39 = arith.mulf %37, %38 : vector<8x8xf32>
    %40 = tpu.concatenate %27, %33, %36, %39 in 1 : vector<8x8xf32>, vector<8x8xf32>, vector<8x8xf32>, vector<8x8xf32> -> vector<8x32xf32>
    %cst_12 = arith.constant 1.000000e-03 : f32
    %41 = vector.broadcast %cst_12 : f32 to vector<8x32xf32>
    %42 = arith.maximumf %40, %41 : vector<8x32xf32>
    %43 = math.log %42 : vector<8x32xf32>
    %c0_13 = arith.constant 0 : index
    %c0_14 = arith.constant 0 : index
    %44 = vector.load %arg3[%c0_13, %c0_14] : memref<8x32xf32, #tpu.memory_space<vmem>>, vector<1x32xf32>
    %c0_15 = arith.constant 0 : index
    %45 = memref.load %arg1[%c0_15] : memref<8xf32, #tpu.memory_space<smem>>
    %46 = vector.broadcast %45 : f32 to vector<8x32xf32>
    %47 = arith.mulf %43, %46 : vector<8x32xf32>
    %c0_16 = arith.constant 0 : index
    %c0_17 = arith.constant 0 : index
    %48 = vector.load %arg4[%c0_16, %c0_17] : memref<8x32xf32, #tpu.memory_space<vmem>>, vector<1x32xf32>
    %49 = vector.broadcast %48 : vector<1x32xf32> to vector<8x32xf32>
    %50 = arith.addf %47, %49 : vector<8x32xf32>
    %51 = math.sin %50 : vector<8x32xf32>
    %52 = vector.broadcast %44 : vector<1x32xf32> to vector<8x32xf32>
    %53 = arith.mulf %52, %51 : vector<8x32xf32>
    %c1 = arith.constant 1 : index
    %c0_18 = arith.constant 0 : index
    %54 = vector.load %arg3[%c1, %c0_18] : memref<8x32xf32, #tpu.memory_space<vmem>>, vector<1x32xf32>
    %c1_19 = arith.constant 1 : index
    %55 = memref.load %arg1[%c1_19] : memref<8xf32, #tpu.memory_space<smem>>
    %56 = vector.broadcast %55 : f32 to vector<8x32xf32>
    %57 = arith.mulf %43, %56 : vector<8x32xf32>
    %c1_20 = arith.constant 1 : index
    %c0_21 = arith.constant 0 : index
    %58 = vector.load %arg4[%c1_20, %c0_21] : memref<8x32xf32, #tpu.memory_space<vmem>>, vector<1x32xf32>
    %59 = vector.broadcast %58 : vector<1x32xf32> to vector<8x32xf32>
    %60 = arith.addf %57, %59 : vector<8x32xf32>
    %61 = math.sin %60 : vector<8x32xf32>
    %62 = vector.broadcast %54 : vector<1x32xf32> to vector<8x32xf32>
    %63 = arith.mulf %62, %61 : vector<8x32xf32>
    %c2 = arith.constant 2 : index
    %c0_22 = arith.constant 0 : index
    %64 = vector.load %arg3[%c2, %c0_22] : memref<8x32xf32, #tpu.memory_space<vmem>>, vector<1x32xf32>
    %c2_23 = arith.constant 2 : index
    %65 = memref.load %arg1[%c2_23] : memref<8xf32, #tpu.memory_space<smem>>
    %66 = vector.broadcast %65 : f32 to vector<8x32xf32>
    %67 = arith.mulf %43, %66 : vector<8x32xf32>
    %c2_24 = arith.constant 2 : index
    %c0_25 = arith.constant 0 : index
    %68 = vector.load %arg4[%c2_24, %c0_25] : memref<8x32xf32, #tpu.memory_space<vmem>>, vector<1x32xf32>
    %69 = vector.broadcast %68 : vector<1x32xf32> to vector<8x32xf32>
    %70 = arith.addf %67, %69 : vector<8x32xf32>
    %71 = math.sin %70 : vector<8x32xf32>
    %72 = vector.broadcast %64 : vector<1x32xf32> to vector<8x32xf32>
    %73 = arith.mulf %72, %71 : vector<8x32xf32>
    %c3 = arith.constant 3 : index
    %c0_26 = arith.constant 0 : index
    %74 = vector.load %arg3[%c3, %c0_26] : memref<8x32xf32, #tpu.memory_space<vmem>>, vector<1x32xf32>
    %c3_27 = arith.constant 3 : index
    %75 = memref.load %arg1[%c3_27] : memref<8xf32, #tpu.memory_space<smem>>
    %76 = vector.broadcast %75 : f32 to vector<8x32xf32>
    %77 = arith.mulf %43, %76 : vector<8x32xf32>
    %c3_28 = arith.constant 3 : index
    %c0_29 = arith.constant 0 : index
    %78 = vector.load %arg4[%c3_28, %c0_29] : memref<8x32xf32, #tpu.memory_space<vmem>>, vector<1x32xf32>
    %79 = vector.broadcast %78 : vector<1x32xf32> to vector<8x32xf32>
    %80 = arith.addf %77, %79 : vector<8x32xf32>
    %81 = math.sin %80 : vector<8x32xf32>
    %82 = vector.broadcast %74 : vector<1x32xf32> to vector<8x32xf32>
    %83 = arith.mulf %82, %81 : vector<8x32xf32>
    %c4 = arith.constant 4 : index
    %c0_30 = arith.constant 0 : index
    %84 = vector.load %arg3[%c4, %c0_30] : memref<8x32xf32, #tpu.memory_space<vmem>>, vector<1x32xf32>
    %c4_31 = arith.constant 4 : index
    %85 = memref.load %arg1[%c4_31] : memref<8xf32, #tpu.memory_space<smem>>
    %86 = vector.broadcast %85 : f32 to vector<8x32xf32>
    %87 = arith.mulf %43, %86 : vector<8x32xf32>
    %c4_32 = arith.constant 4 : index
    %c0_33 = arith.constant 0 : index
    %88 = vector.load %arg4[%c4_32, %c0_33] : memref<8x32xf32, #tpu.memory_space<vmem>>, vector<1x32xf32>
    %89 = vector.broadcast %88 : vector<1x32xf32> to vector<8x32xf32>
    %90 = arith.addf %87, %89 : vector<8x32xf32>
    %91 = math.sin %90 : vector<8x32xf32>
    %92 = vector.broadcast %84 : vector<1x32xf32> to vector<8x32xf32>
    %93 = arith.mulf %92, %91 : vector<8x32xf32>
    %94 = arith.addf %53, %93 : vector<8x32xf32>
    %c5 = arith.constant 5 : index
    %c0_34 = arith.constant 0 : index
    %95 = vector.load %arg3[%c5, %c0_34] : memref<8x32xf32, #tpu.memory_space<vmem>>, vector<1x32xf32>
    %c5_35 = arith.constant 5 : index
    %96 = memref.load %arg1[%c5_35] : memref<8xf32, #tpu.memory_space<smem>>
    %97 = vector.broadcast %96 : f32 to vector<8x32xf32>
    %98 = arith.mulf %43, %97 : vector<8x32xf32>
    %c5_36 = arith.constant 5 : index
    %c0_37 = arith.constant 0 : index
    %99 = vector.load %arg4[%c5_36, %c0_37] : memref<8x32xf32, #tpu.memory_space<vmem>>, vector<1x32xf32>
    %100 = vector.broadcast %99 : vector<1x32xf32> to vector<8x32xf32>
    %101 = arith.addf %98, %100 : vector<8x32xf32>
    %102 = math.sin %101 : vector<8x32xf32>
    %103 = vector.broadcast %95 : vector<1x32xf32> to vector<8x32xf32>
    %104 = arith.mulf %103, %102 : vector<8x32xf32>
    %105 = arith.addf %63, %104 : vector<8x32xf32>
    %c6 = arith.constant 6 : index
    %c0_38 = arith.constant 0 : index
    %106 = vector.load %arg3[%c6, %c0_38] : memref<8x32xf32, #tpu.memory_space<vmem>>, vector<1x32xf32>
    %c6_39 = arith.constant 6 : index
    %107 = memref.load %arg1[%c6_39] : memref<8xf32, #tpu.memory_space<smem>>
    %108 = vector.broadcast %107 : f32 to vector<8x32xf32>
    %109 = arith.mulf %43, %108 : vector<8x32xf32>
    %c6_40 = arith.constant 6 : index
    %c0_41 = arith.constant 0 : index
    %110 = vector.load %arg4[%c6_40, %c0_41] : memref<8x32xf32, #tpu.memory_space<vmem>>, vector<1x32xf32>
    %111 = vector.broadcast %110 : vector<1x32xf32> to vector<8x32xf32>
    %112 = arith.addf %109, %111 : vector<8x32xf32>
    %113 = math.sin %112 : vector<8x32xf32>
    %114 = vector.broadcast %106 : vector<1x32xf32> to vector<8x32xf32>
    %115 = arith.mulf %114, %113 : vector<8x32xf32>
    %116 = arith.addf %73, %115 : vector<8x32xf32>
    %c7 = arith.constant 7 : index
    %c0_42 = arith.constant 0 : index
    %117 = vector.load %arg3[%c7, %c0_42] : memref<8x32xf32, #tpu.memory_space<vmem>>, vector<1x32xf32>
    %c7_43 = arith.constant 7 : index
    %118 = memref.load %arg1[%c7_43] : memref<8xf32, #tpu.memory_space<smem>>
    %119 = vector.broadcast %118 : f32 to vector<8x32xf32>
    %120 = arith.mulf %43, %119 : vector<8x32xf32>
    %c7_44 = arith.constant 7 : index
    %c0_45 = arith.constant 0 : index
    %121 = vector.load %arg4[%c7_44, %c0_45] : memref<8x32xf32, #tpu.memory_space<vmem>>, vector<1x32xf32>
    %122 = vector.broadcast %121 : vector<1x32xf32> to vector<8x32xf32>
    %123 = arith.addf %120, %122 : vector<8x32xf32>
    %124 = math.sin %123 : vector<8x32xf32>
    %125 = vector.broadcast %117 : vector<1x32xf32> to vector<8x32xf32>
    %126 = arith.mulf %125, %124 : vector<8x32xf32>
    %127 = arith.addf %83, %126 : vector<8x32xf32>
    %128 = arith.addf %94, %105 : vector<8x32xf32>
    %129 = arith.addf %116, %127 : vector<8x32xf32>
    %130 = arith.addf %128, %129 : vector<8x32xf32>
    %131 = vector.extract_strided_slice %130 {offsets = [0, 0], sizes = [8, 8], strides = [1, 1]} : vector<8x32xf32> to vector<8x8xf32>
    %132 = vector.extract_strided_slice %130 {offsets = [0, 8], sizes = [8, 8], strides = [1, 1]} : vector<8x32xf32> to vector<8x8xf32>
    %133 = arith.addf %131, %132 : vector<8x8xf32>
    %134 = vector.extract_strided_slice %130 {offsets = [0, 16], sizes = [8, 8], strides = [1, 1]} : vector<8x32xf32> to vector<8x8xf32>
    %135 = arith.addf %133, %134 : vector<8x8xf32>
    %136 = vector.extract_strided_slice %130 {offsets = [0, 24], sizes = [8, 8], strides = [1, 1]} : vector<8x32xf32> to vector<8x8xf32>
    %137 = arith.addf %135, %136 : vector<8x8xf32>
    %c0_46 = arith.constant 0 : index
    %138 = memref.load %arg2[%c0_46] : memref<1xf32, #tpu.memory_space<smem>>
    %139 = vector.broadcast %138 : f32 to vector<8x8xf32>
    %140 = arith.addf %137, %139 : vector<8x8xf32>
    %cst_47 = arith.constant 0.000000e+00 : f32
    %141 = vector.broadcast %cst_47 : f32 to vector<8x8xf32>
    %142 = arith.maximumf %140, %141 : vector<8x8xf32>
    %cst_48 = arith.constant dense<0xFF800000> : vector<8xf32>
    %143 = vector.multi_reduction <maximumf>, %142, %cst_48 [1] : vector<8x8xf32> to vector<8xf32>
    %144 = vector.shape_cast %143 : vector<8xf32> to vector<8x1xf32>
    %145 = vector.broadcast %144 : vector<8x1xf32> to vector<8x8xf32>
    %146 = arith.subf %142, %145 : vector<8x8xf32>
    %147 = math.exp %146 : vector<8x8xf32>
    %cst_49 = arith.constant dense<0.000000e+00> : vector<8xf32>
    %148 = vector.multi_reduction <add>, %147, %cst_49 [1] : vector<8x8xf32> to vector<8xf32>
    %149 = vector.shape_cast %148 : vector<8xf32> to vector<8x1xf32>
    %150 = tpu.reciprocal %149 {approx = true} : vector<8x1xf32> -> vector<8x1xf32>
    %151 = vector.broadcast %150 : vector<8x1xf32> to vector<8x8xf32>
    %152 = arith.mulf %147, %151 : vector<8x8xf32>
    %153 = arith.truncf %152 : vector<8x8xf32> to vector<8x8xbf16>
    %c0_50 = arith.constant 0 : index
    %c0_51 = arith.constant 0 : index
    %c0_52 = arith.constant 0 : index
    %154 = vector.load %arg7[%c0_50, %c0_51, %c0_52] : memref<1x8x64xbf16, #tpu.memory_space<vmem>>, vector<1x8x64xbf16>
    %155 = vector.shape_cast %154 : vector<1x8x64xbf16> to vector<8x64xbf16>
    %cst_53 = arith.constant dense<0.000000e+00> : vector<8x64xf32>
    %156 = tpu.matmul %153, %155, %cst_53 {dimension_numbers = #tpu.dot_dimension_numbers<[1], [0], [0], [1], [0, 0, 1, 1], [], []>} : vector<8x8xbf16>, vector<8x64xbf16>, vector<8x64xf32> -> vector<8x64xf32>
    %157 = arith.truncf %156 : vector<8x64xf32> to vector<8x64xbf16>
    %cst_54 = arith.constant dense<0.000000e+00> : vector<8x256xf32>
    %158 = tpu.matmul %157, %0, %cst_54 {dimension_numbers = #tpu.dot_dimension_numbers<[1], [0], [0], [1], [0, 0, 1, 1], [], []>} : vector<8x64xbf16>, vector<64x256xbf16>, vector<8x256xf32> -> vector<8x256xf32>
    %159 = vector.broadcast %1 : vector<1x256xf32> to vector<8x256xf32>
    %160 = arith.addf %158, %159 : vector<8x256xf32>
    %c0_55 = arith.constant 0 : index
    %c0_56 = arith.constant 0 : index
    %c0_57 = arith.constant 0 : index
    %161 = vector.load %arg10[%c0_55, %c0_56, %c0_57] : memref<1x8x256xf32, #tpu.memory_space<vmem>>, vector<1x8x256xf32>
    %162 = vector.shape_cast %161 : vector<1x8x256xf32> to vector<8x256xf32>
    %163 = vector.shape_cast %160 : vector<8x256xf32> to vector<1x8x256xf32>
    tpu.vector_store %arg10[%c0_55, %c0_56, %c0_57], %163 {strides = array<i32>} : memref<1x8x256xf32, #tpu.memory_space<vmem>>, vector<1x8x256xf32>,
    return
  }
  func.func @transform_0(%arg0: i32) -> i32 {
    %c0_i32 = arith.constant 0 : i32
    %c0_i32_0 = arith.constant 0 : i32
    return %c0_i32 : i32
  }
  func.func @transform_1(%arg0: i32) -> i32 {
    %c0_i32 = arith.constant 0 : i32
    %c0_i32_0 = arith.constant 0 : i32
    return %c0_i32 : i32
  }
  func.func @transform_2(%arg0: i32) -> (i32, i32) {
    %c0_i32 = arith.constant 0 : i32
    %c0_i32_0 = arith.constant 0 : i32
    %c0_i32_1 = arith.constant 0 : i32
    return %c0_i32, %c0_i32_0 : i32, i32
  }
  func.func @transform_3(%arg0: i32) -> (i32, i32) {
    %c0_i32 = arith.constant 0 : i32
    %c0_i32_0 = arith.constant 0 : i32
    %c0_i32_1 = arith.constant 0 : i32
    return %c0_i32, %c0_i32_0 : i32, i32
  }
  func.func @transform_4(%arg0: i32) -> (i32, i32, i32) {
    %c0_i32 = arith.constant 0 : i32
    %c0_i32_0 = arith.constant 0 : i32
    %c0_i32_1 = arith.constant 0 : i32
    return %arg0, %c0_i32, %c0_i32_0 : i32, i32, i32
  }
  func.func @transform_5(%arg0: i32) -> (i32, i32, i32) {
    %c0_i32 = arith.constant 0 : i32
    %c0_i32_0 = arith.constant 0 : i32
    %c0_i32_1 = arith.constant 0 : i32
    return %arg0, %c0_i32, %c0_i32_0 : i32, i32, i32
  }
  func.func @transform_6(%arg0: i32) -> (i32, i32, i32) {
    %c0_i32 = arith.constant 0 : i32
    %c0_i32_0 = arith.constant 0 : i32
    %c0_i32_1 = arith.constant 0 : i32
    return %arg0, %c0_i32, %c0_i32_0 : i32, i32, i32
  }
  func.func @transform_7(%arg0: i32) -> (i32, i32) {
    %c0_i32 = arith.constant 0 : i32
    %c0_i32_0 = arith.constant 0 : i32
    %c0_i32_1 = arith.constant 0 : i32
    return %c0_i32, %c0_i32_0 : i32, i32
  }
  func.func @transform_8(%arg0: i32) -> (i32, i32) {
    %c0_i32 = arith.constant 0 : i32
    %c0_i32_0 = arith.constant 0 : i32
    %c0_i32_1 = arith.constant 0 : i32
    return %c0_i32, %c0_i32_0 : i32, i32
  }
  func.func @transform_9(%arg0: i32) -> (i32, i32, i32) {
    %c0_i32 = arith.constant 0 : i32
    %c0_i32_0 = arith.constant 0 : i32
    %c0_i32_1 = arith.constant 0 : i32
    return %arg0, %c0_i32, %c0_i32_0 : i32, i32, i32
  }
}

</mosaic_0001>

<bundles_post_ra>
// kernel: tpu_custom_call.1
= control target key start
LH: loop header
LB: loop body
LE: loop exit
PB: predicated region body
PF: predicated region fallthrough
CT: control target
= control target key end

     0   :  { %s3190_s0 = inlined_call_operand.hbm [shape: f32[8], index: 0, kind: input, shape index: {}]   ;;  %s3191_s1 = inlined_call_operand.<no memory space> [shape: f32[1], index: 1, kind: input, shape index: {}]   ;;  %s3192_s2 = inlined_call_operand.vmem [shape: f32[8,32], index: 2, kind: input, shape index: {}]   ;;  %s3193_s3 = inlined_call_operand.vmem [shape: f32[8,32], index: 3, kind: input, shape index: {}]   ;;  %s3194_s4 = inlined_call_operand.vmem [shape: f32[2,8,4], index: 4, kind: input, shape index: {}]   ;;  %s3195_s5 = inlined_call_operand.vmem [shape: f32[2,4,8], index: 5, kind: input, shape index: {}]   ;;  %s3196_s6 = inlined_call_operand.vmem [shape: bf16[2,8,64], index: 6, kind: input, shape index: {}]   ;;  %s3197_s7 = inlined_call_operand.hbm [shape: bf16[64,256], index: 7, kind: input, shape index: {}]   ;;  %s3198_s8 = inlined_call_operand.vmem [shape: f32[1,256], index: 8, kind: input, shape index: {}]   ;;  %s3199_s9 = inlined_call_operand.hbm [shape: f32[2,8,256], index: 9, kind: output, shape index: {}]  }
   0x1   :  { %14 = sst [smem:[#allocation2]] %s3191_s1 }
   0x2   :  { %15 = vsyncpa [#allocation6], 0 }
   0x3   :  { %16 = vsyncpa [#allocation4], 0 }
   0x4   :  { %17 = vsyncpa [#allocation5], 0 }
   0x5   :  { %19 = vsyncpa [#allocation5 + $0x1], 0  ;;  %s2173_s11 = smov 0   ;;  %s2175_s12 = smov 0  }
   0x6   :  { %s2177_s13 = smov 0   ;;  %s2179_s14 = smov 0  }
   0x7 LB: > { %s2194_s1 = sadd.s32 4294967295, %s2095_s14   ;;  %s1724_s15 = sadd.s32 4294967294, %s2095_s14   ;;  %s2095_s14 = sphi %s2179_s14, %s3250_s14   ;;  %s2091_s13 = sphi %s2177_s13, %s3249_s13   ;;  %s2087_s12 = sphi %s2175_s12, %s3248_s12   ;;  %s2083_s11 = sphi %s2173_s11, %s3247_s11  }
   0x8   : > { %s2198_s16 = sadd.s32 1, %s2095_s14   ;;  %s236_s17 = sadd.s32 1, %s2091_s13 }
   0x9   : > { %s233_s18 = ssub.s32 %s2095_s14, %s2198_s16  ;;  %p246_p0 = scmp.ne.s32.totalorder %s2091_s13, %s2087_s12 }
   0xa   : > { %p234_p1 = scmp.eq.s32.totalorder %s233_s18, 0  ;;  %p247_p2 = scmp.eq.s32.totalorder %s2194_s1, 1 }
   0xb   : > { %p252_p3 = scmp.ne.s32.totalorder %s2087_s12, %s2083_s11  ;;  %p253_p4 = scmp.eq.s32.totalorder %s1724_s15, 1 }
   0xc   : > { %s2209_s19 = scalar_select %p234_p1, %s2091_s13, %s236_s17  }
   0xd   : > { %p2211_p5 = por %p247_p2, %p246_p0  ;;  %p2215_p6 = por %p253_p4, %p252_p3 }
   0xe   : > { %3210 = sst [smem:[#allocation12_spill]] %s2209_s19  ;;  %p1725_p7 = scmp.ge.s32.totalorder %s2095_s14, 1 }
   0xf   : > { %s3212_s21 = scalar_select %p2215_p6, 1, 0 }
  0x10   : > { %p260_p8 = scmp.lt.s32.totalorder %s2095_s14, 3  ;;  %p3200_p10 = scmp.eq.s32.totalorder %s2194_s1, 0 }
  0x11   : > { %s2097_s23 = smov [#allocation7]   ;;  %s1984_s28 = scalar_lea.hbm %s3190_s0, 16 }
  0x12   : > { %p2221_p9 = pnand %p1725_p7, %p260_p8  ;;  %s290_s24 = sshll.u32 %s2097_s23, 4  ;;  %s2234_s24 = int_to_ptr.vmem [resolvable:$true] %s290_s24 }
  0x13   : > { %p1985_p13 = scmp.ne.s32.totalorder %s3190_s0, %s1984_s28  ;;  %p1991_p3 = scmp.lt.u32.totalorder %s1984_s28, %s3190_s0 }
  0x14   : > { %p1857_p11 = pneg %p2221_p9 }
  0x16   : > { %p2230_p12 = pnand %p3200_p10, %p1857_p11 }
  0x18   : > { %p1986_p0 = pneg %p2230_p12 }
  0x1a   : > { %p1987_p1 = pnand %p1986_p0, %p1985_p13 }
  0x1c   : > { %p1988_p2 = pneg %p1987_p1 }
  0x1e   : > { %p1993_p4 = pnand %p1991_p3, %p1988_p2 }
  0x20   : > { %1996 = shalt.err (!%p1993_p4)
}
  0x21   : > { %s2098_s17 = smov [#allocation3]   ;;  %s1997_s29 = scalar_lea.hbm %s3197_s7, 1024 }
  0x22   : > { %1860 = dma.hbm_to_smem (!%p2230_p12), %s3190_s0, 16, %s2098_s17, [#allocation6]  }
  0x23   : > { %p1998_p7 = scmp.ne.s32.totalorder %s3197_s7, %s1997_s29  ;;  %p2004_p13 = scmp.lt.u32.totalorder %s1997_s29, %s3197_s7 }
  0x25   : > { %p2000_p8 = pnand %p1998_p7, %p1986_p0 }
  0x27   : > { %p2001_p11 = pneg %p2000_p8 }
  0x29   : > { %p2006_p1 = pnand %p2004_p13, %p2001_p11 }
  0x2b   : > { %2009 = shalt.err (!%p2006_p1)
}
  0x2c   : > { %s2010_s15 = scalar_lea.vmem %s2234_s24, 1024  ;;  %p2018_p10 = scmp.lt.s32.totalorder %s2234_s24, %s2234_s24 }
  0x2d   : > { %p2011_p2 = scmp.ne.s32.totalorder %s2234_s24, %s2010_s15  ;;  %p2019_p7 = scmp.lt.s32.totalorder %s2010_s15, %s2010_s15 }
  0x2f   : > { %p2013_p3 = pnand %p2011_p2, %p1986_p0  ;;  %p2020_p8 = por %p2019_p7, %p2018_p10 }
  0x31   : > { %p2014_p4 = pneg %p2013_p3 }
  0x33   : > { %p2021_p6 = pnand %p2020_p8, %p2014_p4 }
  0x35   : > { %2024 = shalt.err (!%p2021_p6)
}
  0x36   : > { %s2099_s19 = smov 128   ;;  %s2100_s17 = smov 8  }
  0x37   : > { %1863 = dma.hbm_to_vmem [thread:$0]  (!%p2230_p12), %s3197_s7, 1024, %s2234_s24, [#allocation4], %s2099_s19, %s2099_s19, %s2100_s17  }
  0x38   : > { %330 = sbr.rel (%p2221_p9) target bundleno = 1463 (0x5b7), region = 56  ;;  %p3215_p0 = scmp.eq.s32.totalorder (!%p2221_p9), %s2194_s1, 0 }
  0x3f   : > { %2070 = dma.done.wait (%p3215_p0), [#allocation6], 16   ;;  %p3216_p11 = pmov %p3215_p0 }
  0x40   : > { %p3217_p6 = pmov %p3215_p0 }
  0x41   : > { %2072 = vsyncadd (%p3216_p11), [#allocation6], 4294967280 }
  0x42   : > { %2074 = dma.done.wait (%p3217_p6), [#allocation4], 1024   ;;  %p3218_p10 = pmov %p3215_p0 }
  0x44   : > { %2076 = vsyncadd (%p3218_p10), [#allocation4], 4294966272 }
  0x45   : > { %340 = sfence }
  0x46   : > { %p378_p13 = scmp.lt.s32.totalorder %s2194_s1, 1  ;;  %v2101_v0 = vmov 1   ;;  %v2102_v1 = vmov 3   ;;  %v2103_v2 = vmov 0   ;;  %v2104_v4 = vmov 2   ;;  %s2105_s15 = smov 8  }
  0x47   : > { %1927 = vset.pattern.permute.xlu0 %v2101_v0  ;;  %1929 = vset.pattern.permute.xlu1 %v2102_v1  ;;  %v405_v7 = vlaneseq  ;;  %s2106_s19 = smov 16   ;;  %s2107_s17 = smov 24   ;;  %vm458_vm0 = vcmask 64512   ;;  %vm460_vm1 = vcmask 130048   ;;  %vm462_vm2 = vcmask 195584  }
  0x48   : > { %s2292_s22 = scalar_select %p378_p13, %s2194_s1, 1  ;;  %1591 = vmatprep.mubr.bf16.mxu1 %v2103_v2  ;;  %v1736_v40 = vld [vmem:[%s3193_s3] ss:$0 sm:$0xff]  ;;  %v1743_v47 = vld [vmem:[%s3193_s3 + $0x1] ss:$0 sm:$0xff] }
  0x49   : > { %v2304_v8 = vshrl.u32 %v405_v7, 7  ;;  %s468_s18 = sld [smem:[#allocation3]]  ;;  %s1742_s23 = sld [smem:[#allocation3 + $0x1]]  ;;  %v2108_v59 = vmov 683565275  }
  0x4a   : > { %s1733_s24 = sshll.u32 %s2292_s22, 3  ;;  %s1734_s29 = sshll.u32 %s2292_s22, 2  ;;  %v2109_v61 = vmov 2475754826   ;;  %v2112_v7 = vmov 920167782  }
  0x4b   : > { %s381_s27 = scalar_lea.vmem %s3194_s4, %s1733_s24  ;;  %s385_s10 = scalar_lea.vmem %s3195_s5, %s1734_s29  ;;  %v3201_v9 = vsub.s32 1, %v2304_v8  ;;  %v433_v11 = vsub.s32 3, %v2304_v8  ;;  %v418_v13 = vsub.s32 2, %v2304_v8  ;;  %v3202_v14 = vsub.s32 0, %v2304_v8 }
  0x4c   : > { %v400_v3 = vld [vmem:[%s381_s27] sm:$0xff]  ;;  %s2328_s30 = sld [smem:[#allocation3 + $0x2]]  ;;  %s2114_s26 = smov 112  }
  0x4d   : > { %426 = vperm.xlu0 %1927, %v400_v3   ;;  %442 = vperm.xlu1 %1929, %v400_v3   ;;  %v401_v5 = vld [vmem:[%s385_s10] sm:$0xf]  ;;  %s2115_s27 = smov 120   ;;  %s1439_s28 = sld [smem:[#allocation2]] }
  0x4e   : > { %v402_v6 = vmax.f32 %v401_v5, 0.001  ;;  %v424_v10 = vrot.slane %v401_v5, %v3201_v9  ;;  %v408_v20 = vrot.slane %v401_v5, %v3202_v14  ;;  %s375_s22 = sand.u32 1, %s2087_s12   ;;  %s2119_s10 = smov [#allocation8]  }
  0x4f   : > { %v469_v38 = vstv %s468_s18  ;;  %v588_v43 = vstv %s1742_s23  ;;  %s2401_s18 = sld [smem:[#allocation3 + $0x4]]  ;;  %s2471_s23 = sld [smem:[#allocation3 + $0x5]] }
  0x50   : > { %1944 = vrcp.f32 %v402_v6 }
  0x51   : > { %1928 = vset.pattern.permute.xlu0 %v2104_v4  ;;  %1930 = vset.pattern.permute.xlu1 %v2103_v2  ;;  %v2111_v4 = vmov 2102212464  }
  0x52   : > { %437 = vperm.xlu0 %1928, %v400_v3   ;;  %411 = vperm.xlu1 %1930, %v400_v3   ;;  %v707_v57 = vstv %s2328_s30  ;;  %s2627_s30 = sld [smem:[#allocation3 + $0x6]] }
  0x56   : > { %1931 = vset.pattern.permute.xlu0 %v2102_v1  ;;  %v2110_v1 = vmov 2131351028  }
  0x5a   : > { %v1945_v12 = vpop.eup %1944 }
  0x5b   : > { %v434_v16 = vrot.slane %v1945_v12, %v433_v11  ;;  %v419_v19 = vrot.slane %v1945_v12, %v418_v13  ;;  %v2113_v12 = vmov 1326507024  }
  0xcc   : > { %v427_v15 = vpop.permute.xlu0 %426  ;;  %v443_v18 = vpop.permute.xlu1 %442 }
  0xcd   : > { %v429_v17 = vsub.f32 %v424_v10, %v427_v15  ;;  %v445_v27 = vmul.f32 %v443_v18, %v434_v16 }
  0xcf   : > { %v430_v21 = vand.u32 2147483647, %v429_v17 }
  0xd1   : > { %v435_v22 = vmul.f32 %v434_v16, %v430_v21  ;;  %v438_v23 = vpop.permute.xlu0 %437  ;;  %v412_v24 = vpop.permute.xlu1 %411 }
  0xd2   : > { %v440_v25 = vmul.f32 %v438_v23, %v419_v19  ;;  %v414_v26 = vsub.f32 %v408_v20, %v412_v24 }
  0xd3   : > { %447 = vrot.lane.b32.xlu1 %v435_v22, %s2105_s15  ;;  %s1756_s15 = sld [smem:[#allocation3 + $0x3]] }
  0xd4   : > { %451 = vrot.lane.b32.xlu0 %v440_v25, %s2106_s19  ;;  %v415_v28 = vand.u32 2147483647, %v414_v26  ;;  %s389_s19 = scalar_lea.vmem %s3196_s6, %s1734_s29  ;;  %s1732_s29 = sshll.u32 %s375_s22, 4 }
  0xd5   : > { %s377_s24 = scalar_lea.vmem [#allocation8], %s1732_s29 }
  0xd6   : > { %v420_v29 = vmul.f32 %v419_v19, %v415_v28  ;;  %s1617_s25 = sshll.u32 %s377_s24, 4  ;;  %s3150_s25 = int_to_ptr.vmem [resolvable:$true] %s1617_s25 }
  0xd7   : > { %455 = vrot.lane.b32.xlu1 %v445_v27, %s2107_s17 }
 0x145   : > { %v448_v30 = vpop.permute.xlu1 %447 }
 0x146   : > { %v459_v31 = vsel %vm458_vm0, %v420_v29, %v448_v30  ;;  %v452_v32 = vpop.permute.xlu0 %451 }
 0x147   : > { %v461_v33 = vsel %vm460_vm1, %v459_v31, %v452_v32 }
 0x149   : > { %v456_v34 = vpop.permute.xlu1 %455 }
 0x14a   : > { %v463_v35 = vsel %vm462_vm2, %v461_v33, %v456_v34 }
 0x14b   : > { %v464_v36 = vmax.f32 %v463_v35, 0.001 }
 0x14d   : > { %1946 = vlog2.f32 %v464_v36 }
 0x157   : > { %v1947_v37 = vpop.eup %1946 }
 0x158   : > { %v2315_v39 = vmul.f32 0.6931472, %v1947_v37 }
 0x15a   : > { %v470_v41 = vmul.f32 %v469_v38, %v2315_v39  ;;  %v589_v45 = vmul.f32 %v588_v43, %v2315_v39  ;;  %v1750_v43 = vld [vmem:[%s3193_s3 + $0x2] ss:$0 sm:$0xff] }
 0x15c   : > { %v2321_v42 = vadd.f32 %v1736_v40, %v470_v41  ;;  %v2330_v49 = vadd.f32 %v1743_v47, %v589_v45  ;;  %v708_v40 = vmul.f32 %v707_v57, %v2315_v39 }
 0x15e   : > { %v480_v44 = vand.u32 2139095040, %v2321_v42  ;;  %v477_v51 = vand.u32 2147483647, %v2321_v42  ;;  %v599_v53 = vand.u32 2139095040, %v2330_v49  ;;  %v2360_v47 = vadd.f32 %v1750_v43, %v708_v40 }
 0x15f   : > { %vm479_vm2 = vcmp.lt.s32.totalorder %v2321_v42, 0 }
 0x160   : > { %v481_v46 = vshrl.u32 %v480_v44, 23  ;;  %v484_v55 = vand.u32 8388607, %v477_v51  ;;  %v600_v63 = vshrl.u32 %v599_v53, 23  ;;  %v718_v53 = vand.u32 2139095040, %v2360_v47 }
 0x161   : > { %vm2435_vm1 = vcmp.le.f32.partialorder %v477_v51, 0.7853982 }
 0x162   : > { %v1737_v48 = vadd.s32 4294967169, %v481_v46  ;;  %v485_v15 = vor.u32 8388608, %v484_v55  ;;  %v1744_v24 = vadd.s32 4294967169, %v600_v63 }
 0x164   : > { %v487_v50 = vadd.s32 1, %v1737_v48  ;;  %v525_v30 = vshll.u32 %v485_v15, 8  ;;  %v606_v45 = vadd.s32 1, %v1744_v24 }
 0x166   : > { %vm488_vm3 = vcmp.gt.s32.totalorder %v487_v50, 0  ;;  %vm607_vm9 = vcmp.gt.s32.totalorder %v606_v45, 0 }
 0x167   : > { %v489_v52 = vsel %vm488_vm3, %v487_v50, 0  ;;  %v608_v55 = vsel %vm607_vm9, %v606_v45, 0  ;;  %vm569_vm9 = vweird.f32 %v2321_v42 }
 0x168   : > { %v491_v54 = vand.u32 31, %v489_v52  ;;  %v490_v58 = vshrl.u32 %v489_v52, 5 }
 0x16a   : > { %v492_v56 = vsub.s32 32, %v491_v54  ;;  %v494_v60 = vshll.u32 %v2108_v59, %v491_v54  ;;  %v497_v62 = vshll.u32 %v2109_v61, %v491_v54  ;;  %v500_v3 = vshll.u32 %v2110_v1, %v491_v54 }
 0x16b   : > { %v503_v6 = vshll.u32 %v2111_v4, %v491_v54  ;;  %v506_v11 = vshll.u32 %v2112_v7, %v491_v54  ;;  %vm509_vm4 = vcmp.lt.s32.totalorder %v490_v58, 1  ;;  %vm512_vm5 = vcmp.lt.s32.totalorder %v490_v58, 4 }
 0x16c   : > { %v495_v0 = vshrl.u32 %v2109_v61, %v492_v56  ;;  %v498_v2 = vshrl.u32 %v2110_v1, %v492_v56  ;;  %v501_v5 = vshrl.u32 %v2111_v4, %v492_v56  ;;  %v504_v10 = vshrl.u32 %v2112_v7, %v492_v56 }
 0x16d   : > { %v507_v13 = vshrl.u32 %v2113_v12, %v492_v56  ;;  %v493_v25 = vshrl.u32 %v2108_v59, %v492_v56  ;;  %vm511_vm6 = vcmp.lt.s32.totalorder %v490_v58, 3  ;;  %vm510_vm7 = vcmp.lt.s32.totalorder %v490_v58, 2 }
 0x16e   : > { %v496_v16 = vor.u32 %v495_v0, %v494_v60  ;;  %v499_v17 = vor.u32 %v498_v2, %v497_v62  ;;  %v502_v18 = vor.u32 %v501_v5, %v500_v3  ;;  %v505_v19 = vor.u32 %v504_v10, %v503_v6  ;;  %v1757_v0 = vld [vmem:[%s3193_s3 + $0x3] ss:$0 sm:$0xff] }
 0x16f   : > { %v508_v20 = vor.u32 %v507_v13, %v506_v11  ;;  %v826_v56 = vstv %s1756_s15  ;;  %v719_v58 = vshrl.u32 %v718_v53, 23  ;;  %v610_v60 = vand.u32 31, %v608_v55  ;;  %s2772_s15 = sld [smem:[#allocation3 + $0x7]] }
 0x170   : > { %v514_v21 = vsel %vm512_vm5, %v502_v18, 2102212464  ;;  %v517_v22 = vsel %vm509_vm4, %v496_v16, %v499_v17  ;;  %v521_v23 = vsel %vm509_vm4, %v499_v17, %v502_v18  ;;  %v518_v26 = vsel %vm512_vm5, %v505_v19, 920167782 }
 0x171   : > { %v522_v27 = vsel %vm512_vm5, %v508_v20, 1326507024  ;;  %v519_v28 = vsel %vm511_vm6, %v502_v18, %v518_v26  ;;  %v513_v31 = vsel %vm509_vm4, %v493_v25, %v496_v16  ;;  %v515_v32 = vsel %vm511_vm6, %v499_v17, %v514_v21 }
 0x172   : > { %v523_v29 = vsel %vm511_vm6, %v505_v19, %v522_v27  ;;  %v520_v33 = vsel %vm510_vm7, %v517_v22, %v519_v28  ;;  %v516_v41 = vsel %vm510_vm7, %v513_v31, %v515_v32  ;;  %v827_v63 = vmul.f32 %v826_v56, %v2315_v39 }
 0x173   : > { %v524_v34 = vsel %vm510_vm7, %v521_v23, %v523_v29  ;;  %v2351_v37 = vmul.u32.u64.low %v525_v30, %v520_v33  ;;  %v2352_v38 = vmul.u32.u64.high %v525_v30, %v520_v33, %v2351_v37  ;;  %v532_v46 = vmul.u32 %v525_v30, %v516_v41 }
 0x174   : > { %v2348_v35 = vmul.u32.u64.low %v525_v30, %v524_v34  ;;  %v2349_v36 = vmul.u32.u64.high %v525_v30, %v524_v34, %v2348_v35  ;;  %v1751_v3 = vadd.s32 4294967169, %v719_v58  ;;  %v3208_v5 = vand.u32 2147483647, %v2330_v49 }
 0x175   : > { %v535_v44 = vadd.s32 1, %v2352_v38  ;;  %v2372_v6 = vsub.s32 32, %v610_v60  ;;  %v2374_v11 = vadd.f32 %v1757_v0, %v827_v63  ;;  %v2380_v19 = vshrl.u32 %v608_v55, 5 }
 0x176   : > { %vm534_vm8 = vc.u32 %v2349_v36, %v2351_v37  ;;  %v725_v15 = vadd.s32 1, %v1751_v3  ;;  %v603_v16 = vand.u32 8388607, %v3208_v5  ;;  %v622_v25 = vshll.u32 %v2111_v4, %v610_v60 }
 0x177   : > { %v536_v48 = vsel %vm534_vm8, %v535_v44, %v2352_v38  ;;  %v623_v17 = vshrl.u32 %v2112_v7, %v2372_v6  ;;  %v626_v20 = vshrl.u32 %v2113_v12, %v2372_v6  ;;  %v837_v21 = vand.u32 2139095040, %v2374_v11 }
 0x178   : > { %v537_v50 = vadd.s32 %v536_v48, %v532_v46  ;;  %v614_v22 = vshrl.u32 %v2109_v61, %v2372_v6  ;;  %v617_v23 = vshrl.u32 %v2110_v1, %v2372_v6  ;;  %v620_v24 = vshrl.u32 %v2111_v4, %v2372_v6 }
 0x179   : > { %v613_v26 = vshll.u32 %v2108_v59, %v610_v60  ;;  %v625_v27 = vshll.u32 %v2112_v7, %v610_v60  ;;  %vm726_vm11 = vcmp.gt.s32.totalorder %v725_v15, 0  ;;  %v616_v29 = vshll.u32 %v2109_v61, %v610_v60 }
 0x17a   : > { %v538_v52 = vadd.s32 536870912, %v537_v50  ;;  %v619_v30 = vshll.u32 %v2110_v1, %v610_v60  ;;  %v624_v31 = vor.u32 %v623_v17, %v622_v25  ;;  %v533_v32 = vadd.s32 %v2351_v37, %v2349_v36 }
 0x17b   : > { %v627_v35 = vor.u32 %v626_v20, %v625_v27  ;;  %v2397_v38 = vor.u32 %v614_v22, %v613_v26  ;;  %v2399_v40 = vor.u32 %v617_v23, %v616_v29  ;;  %v727_v43 = vsel %vm726_vm11, %v725_v15, 0 }
 0x17c   : > { %v2364_v54 = vshrl.u32 %v538_v52, 30  ;;  %v621_v41 = vor.u32 %v620_v24, %v619_v30  ;;  %vm631_vm12 = vcmp.lt.s32.totalorder %v2380_v19, 4  ;;  %v838_v36 = vshrl.u32 %v837_v21, 23 }
 0x17d   : > { %v637_v48 = vsel %vm631_vm12, %v624_v31, 920167782  ;;  %v641_v52 = vsel %vm631_vm12, %v627_v35, 1326507024  ;;  %v729_v53 = vand.u32 31, %v727_v43  ;;  %vm628_vm13 = vcmp.lt.s32.totalorder %v2380_v19, 1 }
 0x17e   : > { %v540_v57 = vshll.u32 %v2364_v54, 30  ;;  %vm630_vm14 = vcmp.lt.s32.totalorder %v2380_v19, 3  ;;  %v604_v56 = vor.u32 8388608, %v603_v16  ;;  %v640_v60 = vsel %vm628_vm13, %v2399_v40, %v621_v41 }
 0x17f   : > { %v638_v58 = vsel %vm630_vm14, %v621_v41, %v637_v48  ;;  %v3207_v63 = vand.u32 2147483647, %v2360_v47  ;;  %v1758_v0 = vadd.s32 4294967169, %v838_v36  ;;  %vm629_vm15 = vcmp.lt.s32.totalorder %v2380_v19, 2 }
 0x180   : > { %v541_v62 = vsub.s32 %v537_v50, %v540_v57  ;;  %v636_v57 = vsel %vm628_vm13, %v2397_v38, %v2399_v40  ;;  %v945_v15 = vstv %s2401_s18  ;;  %v563_v17 = vsub.s32 4, %v2364_v54 }
 0x181   : > { %v2431_v20 = vshll.u32 %v604_v56, 8  ;;  %v722_v22 = vand.u32 8388607, %v3207_v63  ;;  %v844_v23 = vadd.s32 1, %v1758_v0  ;;  %v633_v51 = vsel %vm631_vm12, %v621_v41, 2102212464 }
 0x182   : > { %v543_v2 = vsub.s32 0, %v541_v62  ;;  %v2455_v30 = vshrl.u32 %v727_v43, 5  ;;  %v735_v43 = vshll.u32 %v2109_v61, %v729_v53  ;;  %v738_v48 = vshll.u32 %v2110_v1, %v729_v53 }
 0x183   : > { %vm845_vm3 = vcmp.gt.s32.totalorder %v844_v23, 0  ;;  %v741_v36 = vshll.u32 %v2111_v4, %v729_v53  ;;  %v946_v0 = vmul.f32 %v945_v15, %v2315_v39  ;;  %v1065_v21 = vstv %s2471_s23  ;;  %s1806_s23 = sshll.u32 %s2194_s1, 8  ;;  %s1603_s1 = scalar_lea.sflag [#allocation5], %s375_s22 }
 0x184   : > { %v1738_v10 = vmin.u32 %v543_v2, %v541_v62  ;;  %vm750_vm4 = vcmp.lt.s32.totalorder %v2455_v30, 4  ;;  %vm747_vm6 = vcmp.lt.s32.totalorder %v2455_v30, 1  ;;  %vm749_vm7 = vcmp.lt.s32.totalorder %v2455_v30, 3 }
 0x185   : > { %vm748_vm8 = vcmp.lt.s32.totalorder %v2455_v30, 2 }
 0x186   : > { %v545_v13 = vclz %v1738_v10  ;;  %v2423_v10 = vsub.s32 32, %v729_v53 }
 0x188   : > { %v1739_v18 = vadd.s32 4294967294, %v545_v13  ;;  %v639_v13 = vsel %vm629_vm15, %v636_v57, %v638_v58  ;;  %v745_v27 = vshrl.u32 %v2113_v12, %v2423_v10  ;;  %v739_v41 = vshrl.u32 %v2111_v4, %v2423_v10 }
 0x189   : > { %v2443_v25 = vmul.u32.u64.low %v2431_v20, %v639_v13  ;;  %v2444_v26 = vmul.u32.u64.high %v2431_v20, %v639_v13, %v2443_v25  ;;  %v1764_v13 = vld [vmem:[%s3193_s3 + $0x4] ss:$0 sm:$0xff] }
 0x18a   : > { %vm1740_vm10 = vcmp.lt.s32.totalorder %v1739_v18, 0  ;;  %v740_v56 = vor.u32 %v739_v41, %v738_v48 }
 0x18b   : > { %v548_v28 = vsel %vm1740_vm10, 0, %v1739_v18 }
 0x18c   : > { %v549_v33 = vsub.s32 32, %v548_v28  ;;  %v553_v34 = vsub.s32 4294967266, %v548_v28  ;;  %v550_v44 = vshll.u32 %v541_v62, %v548_v28  ;;  %v642_v62 = vsel %vm630_vm14, %v624_v31, %v641_v52 }
 0x18d   : > { %v643_v18 = vsel %vm629_vm15, %v640_v60, %v642_v62  ;;  %v733_v52 = vshrl.u32 %v2109_v61, %v2423_v10  ;;  %v654_v60 = vadd.s32 1, %v2444_v26 }
 0x18e   : > { %v551_v45 = vshrl.u32 %v533_v32, %v549_v33  ;;  %v554_v46 = vadd.s32 127, %v553_v34  ;;  %v2452_v28 = vmul.u32.u64.low %v2431_v20, %v643_v18  ;;  %v2453_v29 = vmul.u32.u64.high %v2431_v20, %v643_v18, %v2452_v28 }
 0x18f   : > { %v564_v32 = vsel %vm479_vm2, %v563_v17, %v2364_v54  ;;  %v736_v33 = vshrl.u32 %v2110_v1, %v2423_v10  ;;  %v744_v34 = vshll.u32 %v2112_v7, %v729_v53  ;;  %v612_v54 = vshrl.u32 %v2108_v59, %v2372_v6 }
 0x190   : > { %v552_v37 = vor.u32 %v551_v45, %v550_v44  ;;  %v555_v50 = vshll.u32 %v554_v46, 23  ;;  %v742_v44 = vshrl.u32 %v2112_v7, %v2423_v10  ;;  %v566_v46 = vsel %vm2435_vm1, 0, %v564_v32 }
 0x191   : > { %v746_v45 = vor.u32 %v745_v27, %v744_v34  ;;  %v634_v6 = vsel %vm630_vm14, %v2399_v40, %v633_v51  ;;  %v570_v58 = vadd.s32 3, %v566_v46  ;;  %vm653_vm5 = vc.u32 %v2453_v29, %v2443_v25 }
 0x192   : > { %v556_v55 = vor.u32 4788187, %v555_v50  ;;  %v559_v3 = vcvt.s32.f32 %v552_v37  ;;  %v632_v37 = vsel %vm628_vm13, %v612_v54, %v2397_v38  ;;  %v846_v50 = vsel %vm845_vm3, %v844_v23, 0 }
 0x193   : > { %v743_v57 = vor.u32 %v742_v44, %v741_v36  ;;  %v760_v38 = vsel %vm750_vm4, %v746_v45, 1326507024  ;;  %v732_v40 = vshll.u32 %v2108_v59, %v729_v53  ;;  %v848_v62 = vand.u32 31, %v846_v50 }
 0x194   : > { %v557_v2 = vand.u32 2147483647, %v556_v55  ;;  %v2486_v55 = vor.u32 %v736_v33, %v735_v43  ;;  %v571_v17 = vand.u32 3, %v570_v58  ;;  %v655_v19 = vsel %vm653_vm5, %v654_v60, %v2444_v26 }
 0x195   : > { %v761_v15 = vsel %vm749_vm7, %v743_v57, %v760_v38  ;;  %v756_v18 = vsel %vm750_vm4, %v743_v57, 920167782  ;;  %v2513_v23 = vsub.s32 32, %v848_v62  ;;  %v3206_v26 = vand.u32 2147483647, %v2374_v11 }
 0x196   : > { %v560_v16 = vmul.f32 %v559_v3, %v557_v2  ;;  %v635_v2 = vsel %vm629_vm15, %v632_v37, %v634_v6  ;;  %v723_v3 = vor.u32 8388608, %v722_v22  ;;  %v759_v53 = vsel %vm747_vm6, %v2486_v55, %v740_v56 }
 0x197   : > { %v651_v22 = vmul.u32 %v2431_v20, %v635_v2  ;;  %v762_v51 = vsel %vm748_vm8, %v759_v53, %v761_v15  ;;  %v757_v34 = vsel %vm749_vm7, %v740_v56, %v756_v18  ;;  %vm572_vm10 = vcmp.lt.s32.totalorder %v571_v17, 2 }
 0x198   : > { %v561_v24 = vxor.u32 2147483648, %v560_v16  ;;  %v2520_v28 = vshll.u32 %v723_v3, 8  ;;  %vm573_vm11 = vcmp.eq.s32.totalorder %v571_v17, 0  ;;  %vm576_vm12 = vcmp.eq.s32.totalorder %v571_v17, 2 }
 0x199   : > { %v2523_v33 = vadd.s32 %v655_v19, %v651_v22  ;;  %v861_v43 = vshrl.u32 %v2112_v7, %v2513_v23  ;;  %v2538_v48 = vshrl.u32 %v846_v50, 5  ;;  %v864_v36 = vshrl.u32 %v2113_v12, %v2513_v23 }
 0x19a   : > { %v562_v31 = vsel %vm479_vm2, %v561_v24, %v560_v16  ;;  %v734_v16 = vor.u32 %v733_v52, %v732_v40  ;;  %v2515_v24 = vadd.f32 %v1764_v13, %v946_v0  ;;  %v852_v6 = vshrl.u32 %v2109_v61, %v2513_v23 }
 0x19b   : > { %v565_v35 = vsel %vm2435_vm1, %v2321_v42, %v562_v31  ;;  %v2531_v44 = vmul.u32.u64.low %v2520_v28, %v762_v51  ;;  %v2532_v54 = vmul.u32.u64.high %v2520_v28, %v762_v51, %v2531_v44  ;;  %v860_v52 = vshll.u32 %v2111_v4, %v848_v62 }
 0x19c   : > { %1948 = vcosq.f32 %v565_v35  ;;  %v755_v20 = vsel %vm747_vm6, %v734_v16, %v2486_v55  ;;  %v956_v57 = vand.u32 2139095040, %v2515_v24  ;;  %v855_v60 = vshrl.u32 %v2110_v1, %v2513_v23 }
 0x19d   : > { %1950 = vsinq.f32 %v565_v35  ;;  %v758_v46 = vsel %vm748_vm8, %v755_v20, %v757_v34  ;;  %v858_v50 = vshrl.u32 %v2111_v4, %v2513_v23  ;;  %v863_v38 = vshll.u32 %v2112_v7, %v848_v62 }
 0x19e   : > { %v2556_v40 = vmul.u32.u64.low %v2520_v28, %v758_v46  ;;  %v2557_v0 = vmul.u32.u64.high %v2520_v28, %v758_v46, %v2556_v40  ;;  %v862_v2 = vor.u32 %v861_v43, %v860_v52  ;;  %v957_v3 = vshrl.u32 %v956_v57, 23 }
 0x19f   : > { %v851_v13 = vshll.u32 %v2108_v59, %v848_v62  ;;  %v854_v42 = vshll.u32 %v2109_v61, %v848_v62  ;;  %v857_v53 = vshll.u32 %v2110_v1, %v848_v62  ;;  %v865_v15 = vor.u32 %v864_v36, %v863_v38 }
 0x1a0   : > { %v731_v17 = vshrl.u32 %v2108_v59, %v2423_v10  ;;  %v752_v19 = vsel %vm750_vm4, %v740_v56, 2102212464  ;;  %v841_v18 = vand.u32 8388607, %v3206_v26  ;;  %v1765_v22 = vadd.s32 4294967169, %v957_v3 }
 0x1a1   : > { %v856_v51 = vor.u32 %v855_v60, %v854_v42  ;;  %vm869_vm13 = vcmp.lt.s32.totalorder %v2538_v48, 4  ;;  %v1066_v20 = vmul.f32 %v1065_v21, %v2315_v39  ;;  %v657_v10 = vadd.s32 536870912, %v2523_v33 }
 0x1a2   : > { %v963_v62 = vadd.s32 1, %v1765_v22  ;;  %v751_v56 = vsel %vm747_vm6, %v731_v17, %v734_v16  ;;  %v879_v34 = vsel %vm869_vm13, %v865_v15, 1326507024  ;;  %vm866_vm14 = vcmp.lt.s32.totalorder %v2538_v48, 1 }
 0x1a3   : > { %vm868_vm15 = vcmp.lt.s32.totalorder %v2538_v48, 3  ;;  %v842_v21 = vor.u32 8388608, %v841_v18  ;;  %vm772_vm2 = vc.u32 %v2532_v54, %v2556_v40  ;;  %vm867_vm3 = vcmp.lt.s32.totalorder %v2538_v48, 2 }
 0x1a4   : > { %vm964_vm1 = vcmp.gt.s32.totalorder %v963_v62, 0  ;;  %v2602_v52 = vshrl.u32 %v657_v10, 30  ;;  %v850_v3 = vshrl.u32 %v2108_v59, %v2513_v23 }
 0x1a5   : > { %v965_v43 = vsel %vm964_vm1, %v963_v62, 0 }
 0x1a6   : > { %v1949_v27 = vpop.eup %1948  ;;  %v659_v15 = vshll.u32 %v2602_v52, 30 }
 0x1a7   : > { %v1951_v31 = vpop.eup %1950  ;;  %v577_v32 = vxor.u32 2147483648, %v1949_v27 }
 0x1a8   : > { %v574_v35 = vxor.u32 2147483648, %v1951_v31 }
 0x1a9   : > { %v578_v41 = vsel %vm576_vm12, %v577_v32, %v1951_v31  ;;  %v859_v31 = vor.u32 %v858_v50, %v857_v53  ;;  %v875_v32 = vsel %vm869_vm13, %v862_v2, 920167782  ;;  %v2608_v50 = vshll.u32 %v842_v21, 8 }
 0x1aa   : > { %v575_v45 = vsel %vm573_vm11, %v1949_v27, %v574_v35  ;;  %v853_v27 = vor.u32 %v852_v6, %v851_v13  ;;  %v1771_v35 = vld [vmem:[%s3193_s3 + $0x5] ss:$0 sm:$0xff]  ;;  %v967_v6 = vand.u32 31, %v965_v43 }
 0x1ab   : > { %v579_v37 = vsel %vm572_vm10, %v575_v45, %v578_v41  ;;  %v753_v41 = vsel %vm749_vm7, %v2486_v55, %v752_v19  ;;  %v876_v44 = vsel %vm868_vm15, %v859_v31, %v875_v32  ;;  %v773_v45 = vadd.s32 1, %v2557_v0 }
 0x1ac   : > { %v2548_v58 = vsel %vm569_vm9, nan, %v579_v37  ;;  %v874_v16 = vsel %vm866_vm14, %v853_v27, %v856_v51  ;;  %v878_v46 = vsel %vm866_vm14, %v856_v51, %v859_v31  ;;  %v880_v55 = vsel %vm868_vm15, %v862_v2, %v879_v34 }
 0x1ad   : > { %v2595_v36 = vadd.f32 %v1771_v35, %v1066_v20  ;;  %v754_v37 = vsel %vm748_vm8, %v751_v56, %v753_v41  ;;  %v877_v57 = vsel %vm867_vm3, %v874_v16, %v876_v44  ;;  %v881_v60 = vsel %vm867_vm3, %v878_v46, %v880_v55 }
 0x1ae   : > { %v2610_v38 = vsub.s32 32, %v967_v6  ;;  %v770_v30 = vmul.u32 %v2520_v28, %v754_v37  ;;  %v774_v2 = vsel %vm772_vm2, %v773_v45, %v2557_v0  ;;  %v870_v23 = vsel %vm866_vm14, %v850_v3, %v853_v27 }
 0x1af   : > { %v2617_v13 = vmul.u32.u64.low %v2608_v50, %v877_v57  ;;  %v2618_v42 = vmul.u32.u64.high %v2608_v50, %v877_v57, %v2617_v13  ;;  %v1076_v53 = vand.u32 2139095040, %v2595_v36  ;;  %v3205_v0 = vand.u32 2147483647, %v2515_v24 }
 0x1b0   : > { %v2624_v17 = vmul.u32.u64.low %v2608_v50, %v881_v60  ;;  %v2625_v19 = vmul.u32.u64.high %v2608_v50, %v881_v60, %v2624_v17  ;;  %v2629_v28 = vadd.s32 %v774_v2, %v770_v30  ;;  %v971_v18 = vshrl.u32 %v2109_v61, %v2610_v38 }
 0x1b1   : > { %v871_v22 = vsel %vm869_vm13, %v859_v31, 2102212464  ;;  %v2638_v32 = vshrl.u32 %v965_v43, 5  ;;  %v974_v62 = vshrl.u32 %v2110_v1, %v2610_v38  ;;  %v977_v20 = vshrl.u32 %v2111_v4, %v2610_v38 }
 0x1b2   : > { %v970_v10 = vshll.u32 %v2108_v59, %v967_v6  ;;  %v979_v27 = vshll.u32 %v2111_v4, %v967_v6  ;;  %v980_v56 = vshrl.u32 %v2112_v7, %v2610_v38  ;;  %v1077_v34 = vshrl.u32 %v1076_v53, 23 }
 0x1b3   : > { %v973_v35 = vshll.u32 %v2109_v61, %v967_v6  ;;  %v976_v31 = vshll.u32 %v2110_v1, %v967_v6  ;;  %v982_v41 = vshll.u32 %v2112_v7, %v967_v6  ;;  %v983_v21 = vshrl.u32 %v2113_v12, %v2610_v38 }
 0x1b4   : > { %v872_v16 = vsel %vm868_vm15, %v856_v51, %v871_v22  ;;  %v960_v44 = vand.u32 8388607, %v3205_v0  ;;  %v972_v43 = vor.u32 %v971_v18, %v970_v10  ;;  %v981_v45 = vor.u32 %v980_v56, %v979_v27 }
 0x1b5   : > { %v975_v46 = vor.u32 %v974_v62, %v973_v35  ;;  %v978_v55 = vor.u32 %v977_v20, %v976_v31  ;;  %v984_v37 = vor.u32 %v983_v21, %v982_v41  ;;  %vm988_vm4 = vcmp.lt.s32.totalorder %v2638_v32, 4  ;;  %v1778_v35 = vld [vmem:[%s3193_s3 + $0x6] ss:$0 sm:$0xff] }
 0x1b6   : > { %v892_v57 = vadd.s32 1, %v2618_v42  ;;  %v994_v6 = vsel %vm988_vm4, %v981_v45, 920167782  ;;  %v1772_v60 = vadd.s32 4294967169, %v1077_v34  ;;  %v2662_v30 = vsub.s32 %v2523_v33, %v659_v15 }
 0x1b7   : > { %v873_v51 = vsel %vm867_vm3, %v870_v23, %v872_v16  ;;  %vm891_vm5 = vc.u32 %v2625_v19, %v2617_v13  ;;  %v1185_v2 = vstv %s2627_s30  ;;  %v776_v3 = vadd.s32 536870912, %v2629_v28  ;;  %s2116_s30 = smov 104  }
 0x1b8   : > { %vm985_vm6 = vcmp.lt.s32.totalorder %v2638_v32, 1  ;;  %vm987_vm7 = vcmp.lt.s32.totalorder %v2638_v32, 3  ;;  %v998_v53 = vsel %vm988_vm4, %v984_v37, 1326507024  ;;  %v961_v17 = vor.u32 8388608, %v960_v44 }
 0x1b9   : > { %v993_v33 = vsel %vm985_vm6, %v972_v43, %v975_v46  ;;  %v995_v48 = vsel %vm987_vm7, %v978_v55, %v994_v6  ;;  %v1083_v15 = vadd.s32 1, %v1772_v60  ;;  %v889_v23 = vmul.u32 %v2608_v50, %v873_v51 }
 0x1ba   : > { %v893_v18 = vsel %vm891_vm5, %v892_v57, %v2618_v42  ;;  %vm986_vm8 = vcmp.lt.s32.totalorder %v2638_v32, 2  ;;  %v997_v22 = vsel %vm985_vm6, %v975_v46, %v978_v55  ;;  %v999_v62 = vsel %vm987_vm7, %v981_v45, %v998_v53 }
 0x1bb   : > { %vm1084_vm9 = vcmp.gt.s32.totalorder %v1083_v15, 0  ;;  %v662_v20 = vsub.s32 0, %v2662_v30  ;;  %v996_v10 = vsel %vm986_vm8, %v993_v33, %v995_v48  ;;  %v1186_v56 = vmul.f32 %v1185_v2, %v2315_v39 }
 0x1bc   : > { %v1085_v27 = vsel %vm1084_vm9, %v1083_v15, 0  ;;  %v2689_v50 = vshrl.u32 %v776_v3, 30  ;;  %v2691_v42 = vadd.s32 %v893_v18, %v889_v23  ;;  %v2693_v34 = vshll.u32 %v961_v17, 8 }
 0x1bd   : > { %v1000_v31 = vsel %vm986_vm8, %v997_v22, %v999_v62  ;;  %v3203_v41 = vand.u32 2147483647, %v2595_v36  ;;  %v1087_v21 = vand.u32 31, %v1085_v27  ;;  %v990_v16 = vsel %vm988_vm4, %v978_v55, 2102212464 }
 0x1be   : > { %v2704_v44 = vmul.u32.u64.low %v2693_v34, %v996_v10  ;;  %v2705_v45 = vmul.u32.u64.high %v2693_v34, %v996_v10, %v2704_v44  ;;  %v1745_v37 = vmin.u32 %v662_v20, %v2662_v30  ;;  %v969_v57 = vshrl.u32 %v2108_v59, %v2610_v38 }
 0x1bf   : > { %v1088_v6 = vsub.s32 32, %v1087_v21  ;;  %v2711_v60 = vadd.f32 %v1778_v35, %v1186_v56  ;;  %v778_v51 = vshll.u32 %v2689_v50, 30  ;;  %v895_v2 = vadd.s32 536870912, %v2691_v42 }
 0x1c0   : > { %v2716_v3 = vmul.u32.u64.low %v2693_v34, %v1000_v31  ;;  %v2717_v55 = vmul.u32.u64.high %v2693_v34, %v1000_v31, %v2716_v3  ;;  %v989_v53 = vsel %vm985_vm6, %v969_v57, %v972_v43  ;;  %v991_v17 = vsel %vm987_vm7, %v975_v46, %v990_v16 }
 0x1c1   : > { %v1080_v38 = vand.u32 8388607, %v3203_v41  ;;  %v1091_v33 = vshrl.u32 %v2109_v61, %v1088_v6  ;;  %v1090_v48 = vshll.u32 %v2108_v59, %v1087_v21  ;;  %v1093_v15 = vshll.u32 %v2109_v61, %v1087_v21 }
 0x1c2   : > { %v1094_v23 = vshrl.u32 %v2110_v1, %v1088_v6  ;;  %v1097_v18 = vshrl.u32 %v2111_v4, %v1088_v6  ;;  %v1086_v22 = vshrl.u32 %v1085_v27, 5  ;;  %v1096_v62 = vshll.u32 %v2110_v1, %v1087_v21 }
 0x1c3   : > { %v1099_v43 = vshll.u32 %v2111_v4, %v1087_v21  ;;  %v1100_v46 = vshrl.u32 %v2112_v7, %v1088_v6  ;;  %v664_v20 = vclz %v1745_v37  ;;  %v2734_v10 = vsub.s32 %v2629_v28, %v778_v51 }
 0x1c4   : > { %v1092_v56 = vor.u32 %v1091_v33, %v1090_v48  ;;  %v1095_v35 = vor.u32 %v1094_v23, %v1093_v15  ;;  %v1098_v31 = vor.u32 %v1097_v18, %v1096_v62  ;;  %v1102_v57 = vshll.u32 %v2112_v7, %v1087_v21 }
 0x1c5   : > { %v1101_v16 = vor.u32 %v1100_v46, %v1099_v43  ;;  %v1103_v3 = vshrl.u32 %v2113_v12, %v1088_v6  ;;  %v2738_v9 = vshrl.u32 %v895_v2, 30  ;;  %v992_v27 = vsel %vm986_vm8, %v989_v53, %v991_v17 }
 0x1c6   : > { %v1011_v14 = vadd.s32 1, %v2705_v45  ;;  %v1081_v41 = vor.u32 8388608, %v1080_v38  ;;  %vm1105_vm10 = vcmp.lt.s32.totalorder %v1086_v22, 1  ;;  %vm1106_vm11 = vcmp.lt.s32.totalorder %v1086_v22, 2 }
 0x1c7   : > { %v1104_v37 = vor.u32 %v1103_v3, %v1102_v57  ;;  %vm1108_vm12 = vcmp.lt.s32.totalorder %v1086_v22, 4  ;;  %vm1010_vm13 = vc.u32 %v2717_v55, %v2704_v44  ;;  %vm1107_vm14 = vcmp.lt.s32.totalorder %v1086_v22, 3 }
 0x1c8   : > { %v1113_v28 = vsel %vm1105_vm10, %v1092_v56, %v1095_v35  ;;  %v1114_v21 = vsel %vm1108_vm12, %v1101_v16, 920167782  ;;  %v1089_v51 = vshrl.u32 %v2108_v59, %v1088_v6  ;;  %v1110_v2 = vsel %vm1108_vm12, %v1098_v31, 2102212464 }
 0x1c9   : > { %v1115_v33 = vsel %vm1107_vm14, %v1098_v31, %v1114_v21  ;;  %v1117_v32 = vsel %vm1105_vm10, %v1095_v35, %v1098_v31  ;;  %v1746_v53 = vadd.s32 4294967294, %v664_v20  ;;  %v1118_v38 = vsel %vm1108_vm12, %v1104_v37, 1326507024 }
 0x1ca   : > { %v1116_v17 = vsel %vm1106_vm11, %v1113_v28, %v1115_v33  ;;  %v1121_v48 = vshll.u32 %v1081_v41, 8  ;;  %v1008_v15 = vmul.u32 %v2693_v34, %v992_v27  ;;  %v1012_v23 = vsel %vm1010_vm13, %v1011_v14, %v2705_v45 }
 0x1cb   : > { %v1109_v18 = vsel %vm1105_vm10, %v1089_v51, %v1092_v56  ;;  %v1119_v62 = vsel %vm1107_vm14, %v1101_v16, %v1118_v38  ;;  %v1111_v43 = vsel %vm1107_vm14, %v1095_v35, %v1110_v2  ;;  %v781_v20 = vsub.s32 0, %v2734_v10 }
 0x1cc   : > { %v1120_v46 = vsel %vm1106_vm11, %v1117_v32, %v1119_v62  ;;  %v2753_v6 = vmul.u32.u64.low %v1121_v48, %v1116_v17  ;;  %v2754_v57 = vmul.u32.u64.high %v1121_v48, %v1116_v17, %v2753_v6  ;;  %v897_v31 = vshll.u32 %v2738_v9, 30 }
 0x1cd   : > { %v2759_v3 = vmul.u32.u64.low %v1121_v48, %v1120_v46  ;;  %v2760_v41 = vmul.u32.u64.high %v1121_v48, %v1120_v46, %v2759_v3  ;;  %vm1747_vm15 = vcmp.lt.s32.totalorder %v1746_v53, 0  ;;  %v1013_v34 = vadd.s32 %v1012_v23, %v1008_v15 }
 0x1ce   : > { %v1196_v14 = vand.u32 2139095040, %v2711_v60  ;;  %v1112_v45 = vsel %vm1106_vm11, %v1109_v18, %v1111_v43  ;;  %v1131_v56 = vadd.s32 1, %v2754_v57  ;;  %v667_v16 = vsel %vm1747_vm15, 0, %v1746_v53 }
 0x1cf   : > { %v1752_v27 = vmin.u32 %v781_v20, %v2734_v10  ;;  %v2767_v37 = vsub.s32 %v2691_v42, %v897_v31  ;;  %vm1130_vm1 = vc.u32 %v2760_v41, %v2753_v6  ;;  %v1014_v28 = vadd.s32 536870912, %v1013_v34 }
 0x1d0   : > { %v1197_v35 = vshrl.u32 %v1196_v14, 23  ;;  %v1128_v21 = vmul.u32 %v1121_v48, %v1112_v45  ;;  %v1132_v51 = vsel %vm1130_vm1, %v1131_v56, %v2754_v57  ;;  %v672_v22 = vsub.s32 4294967266, %v667_v16 }
 0x1d1   : > { %v783_v17 = vclz %v1752_v27  ;;  %v900_v53 = vsub.s32 0, %v2767_v37  ;;  %v2775_v38 = vshrl.u32 %v1014_v28, 30  ;;  %v668_v15 = vsub.s32 32, %v667_v16 }
 0x1d2   : > { %v1779_v2 = vadd.s32 4294967169, %v1197_v35  ;;  %v1133_v33 = vadd.s32 %v1132_v51, %v1128_v21  ;;  %v673_v23 = vadd.s32 127, %v672_v22  ;;  %v652_v46 = vadd.s32 %v2443_v25, %v2453_v29 }
 0x1d3   : > { %v1753_v62 = vadd.s32 4294967294, %v783_v17  ;;  %v1759_v43 = vmin.u32 %v900_v53, %v2767_v37  ;;  %v1016_v57 = vshll.u32 %v2775_v38, 30  ;;  %v3204_v20 = vand.u32 2147483647, %v2711_v60 }
 0x1d4   : > { %v1203_v32 = vadd.s32 1, %v1779_v2  ;;  %v1134_v18 = vadd.s32 536870912, %v1133_v33  ;;  %v669_v3 = vshll.u32 %v2662_v30, %v667_v16  ;;  %v1305_v14 = vstv %s2772_s15  ;;  %s2029_s15 = sshll.u32 %s2119_s10, 4  ;;  %s2030_s15 = int_to_ptr.vmem [resolvable:$false] %s2029_s15 }
 0x1d5   : > { %v670_v45 = vshrl.u32 %v652_v46, %v668_v15  ;;  %v674_v56 = vshll.u32 %v673_v23, 23  ;;  %vm1754_vm3 = vcmp.lt.s32.totalorder %v1753_v62, 0  ;;  %v902_v28 = vclz %v1759_v43  ;;  %p2032_p2 = scmp.lt.s32.totalorder %s3150_s25, %s2030_s15 }
 0x1d6   : > { %vm1204_vm2 = vcmp.gt.s32.totalorder %v1203_v32, 0  ;;  %v2784_v35 = vshrl.u32 %v1134_v18, 30  ;;  %v2789_v29 = vsub.s32 %v1013_v34, %v1016_v57  ;;  %v1200_v51 = vand.u32 8388607, %v3204_v20  ;;  %v1785_v18 = vld [vmem:[%s3193_s3 + $0x7] ss:$0 sm:$0xff] }
 0x1d7   : > { %v1205_v42 = vsel %vm1204_vm2, %v1203_v32, 0  ;;  %v1306_v16 = vmul.f32 %v1305_v14, %v2315_v39  ;;  %v671_v14 = vor.u32 %v670_v45, %v669_v3  ;;  %v675_v20 = vor.u32 4788187, %v674_v56 }
 0x1d8   : > { %v1207_v48 = vand.u32 31, %v1205_v42  ;;  %v1136_v53 = vshll.u32 %v2784_v35, 30  ;;  %v1206_v15 = vshrl.u32 %v1205_v42, 5  ;;  %v1201_v0 = vor.u32 8388608, %v1200_v51 }
 0x1d9   : > { %v2806_v26 = vsel %vm1754_vm3, 0, %v1753_v62  ;;  %v1760_v63 = vadd.s32 4294967294, %v902_v28  ;;  %vm598_vm11 = vcmp.lt.s32.totalorder %v2330_v49, 0 }
 0x1da   : > { %v1208_v31 = vsub.s32 32, %v1207_v48  ;;  %v1210_v30 = vshll.u32 %v2108_v59, %v1207_v48  ;;  %v1213_v2 = vshll.u32 %v2109_v61, %v1207_v48  ;;  %v1216_v22 = vshll.u32 %v2110_v1, %v1207_v48 }
 0x1db   : > { %v1219_v32 = vshll.u32 %v2111_v4, %v1207_v48  ;;  %v1222_v57 = vshll.u32 %v2112_v7, %v1207_v48  ;;  %v2811_v5 = vsub.s32 %v1133_v33, %v1136_v53  ;;  %vm1225_vm4 = vcmp.lt.s32.totalorder %v1206_v15, 1 }
 0x1dc   : > { %v1211_v27 = vshrl.u32 %v2109_v61, %v1208_v31  ;;  %v1214_v21 = vshrl.u32 %v2110_v1, %v1208_v31  ;;  %v1217_v25 = vshrl.u32 %v2111_v4, %v1208_v31  ;;  %v1220_v17 = vshrl.u32 %v2112_v7, %v1208_v31 }
 0x1dd   : > { %v1223_v23 = vshrl.u32 %v2113_v12, %v1208_v31  ;;  %vm1228_vm5 = vcmp.lt.s32.totalorder %v1206_v15, 4  ;;  %vm1227_vm6 = vcmp.lt.s32.totalorder %v1206_v15, 3  ;;  %v1209_v3 = vshrl.u32 %v2108_v59, %v1208_v31 }
 0x1de   : > { %v1212_v34 = vor.u32 %v1211_v27, %v1210_v30  ;;  %v1215_v43 = vor.u32 %v1214_v21, %v1213_v2  ;;  %v1218_v39 = vor.u32 %v1217_v25, %v1216_v22  ;;  %v1221_v46 = vor.u32 %v1220_v17, %v1219_v32 }
 0x1df   : > { %v1224_v42 = vor.u32 %v1223_v23, %v1222_v57  ;;  %v2808_v27 = vadd.f32 %v1785_v18, %v1306_v16  ;;  %v1019_v30 = vsub.s32 0, %v2789_v29  ;;  %vm1226_vm7 = vcmp.lt.s32.totalorder %v1206_v15, 2 }
 0x1e0   : > { %v1230_v21 = vsel %vm1228_vm5, %v1218_v39, 2102212464  ;;  %v1233_v25 = vsel %vm1225_vm4, %v1212_v34, %v1215_v43  ;;  %v1234_v48 = vsel %vm1228_vm5, %v1221_v46, 920167782  ;;  %v1241_v62 = vshll.u32 %v1201_v0, 8 }
 0x1e1   : > { %v1235_v45 = vsel %vm1227_vm6, %v1218_v39, %v1234_v48  ;;  %v1237_v28 = vsel %vm1225_vm4, %v1215_v43, %v1218_v39  ;;  %v1238_v51 = vsel %vm1228_vm5, %v1224_v42, 1326507024  ;;  %v1316_v16 = vand.u32 2139095040, %v2808_v27 }
 0x1e2   : > { %v1236_v56 = vsel %vm1226_vm7, %v1233_v25, %v1235_v45  ;;  %v1139_v33 = vsub.s32 0, %v2811_v5  ;;  %v1229_v2 = vsel %vm1225_vm4, %v1209_v3, %v1212_v34  ;;  %v1231_v22 = vsel %vm1227_vm6, %v1215_v43, %v1230_v21 }
 0x1e3   : > { %v1239_v32 = vsel %vm1227_vm6, %v1221_v46, %v1238_v51  ;;  %v1766_v17 = vmin.u32 %v1019_v30, %v2789_v29  ;;  %v2819_v23 = vmul.u32.u64.low %v1241_v62, %v1236_v56  ;;  %v2820_v31 = vmul.u32.u64.high %v1241_v62, %v1236_v56, %v2819_v23 }
 0x1e4   : > { %v1240_v53 = vsel %vm1226_vm7, %v1237_v28, %v1239_v32  ;;  %v676_v0 = vand.u32 2147483647, %v675_v20  ;;  %v791_v39 = vsub.s32 4294967266, %v2806_v26  ;;  %v1232_v42 = vsel %vm1226_vm7, %v1229_v2, %v1231_v22 }
 0x1e5   : > { %v2823_v18 = vmul.u32.u64.low %v1241_v62, %v1240_v53  ;;  %v2824_v57 = vmul.u32.u64.high %v1241_v62, %v1240_v53, %v2823_v18  ;;  %v1317_v25 = vshrl.u32 %v1316_v16, 23  ;;  %v678_v34 = vcvt.s32.f32 %v671_v14 }
 0x1e6   : > { %v1773_v43 = vmin.u32 %v1139_v33, %v2811_v5  ;;  %vm1761_vm8 = vcmp.lt.s32.totalorder %v1760_v63, 0  ;;  %v1021_v46 = vclz %v1766_v17  ;;  %v1251_v30 = vadd.s32 1, %v2820_v31 }
 0x1e7   : > { %v1786_v21 = vadd.s32 4294967169, %v1317_v25  ;;  %v679_v48 = vmul.f32 %v678_v34, %v676_v0  ;;  %v1248_v3 = vmul.u32 %v1241_v62, %v1232_v42  ;;  %vm1250_vm9 = vc.u32 %v2824_v57, %v2819_v23 }
 0x1e8   : > { %v787_v20 = vsub.s32 32, %v2806_v26  ;;  %v792_v45 = vadd.s32 127, %v791_v39  ;;  %v1252_v15 = vsel %vm1250_vm9, %v1251_v30, %v2820_v31  ;;  %v2834_v28 = vsel %vm1761_vm8, 0, %v1760_v63 }
 0x1e9   : > { %v1323_v56 = vadd.s32 1, %v1786_v21  ;;  %v1141_v14 = vclz %v1773_v43  ;;  %v1253_v51 = vadd.s32 %v1252_v15, %v1248_v3  ;;  %v771_v16 = vadd.s32 %v2556_v40, %v2532_v54 }
 0x1ea   : > { %v1767_v33 = vadd.s32 4294967294, %v1021_v46  ;;  %v680_v2 = vxor.u32 2147483648, %v679_v48  ;;  %v793_v17 = vshll.u32 %v792_v45, 23  ;;  %v910_v53 = vsub.s32 4294967266, %v2834_v28 }
 0x1eb   : > { %vm1324_vm10 = vcmp.gt.s32.totalorder %v1323_v56, 0  ;;  %v1254_v62 = vadd.s32 536870912, %v1253_v51  ;;  %v789_v32 = vshrl.u32 %v771_v16, %v787_v20  ;;  %v1774_v31 = vadd.s32 4294967294, %v1141_v14 }
 0x1ec   : > { %v1325_v22 = vsel %vm1324_vm10, %v1323_v56, 0  ;;  %v788_v18 = vshll.u32 %v2734_v10, %v2806_v26  ;;  %vm1768_vm12 = vcmp.lt.s32.totalorder %v1767_v33, 0  ;;  %v3209_v54 = vand.u32 2147483647, %v2808_v27 }
 0x1ed   : > { %v1327_v0 = vand.u32 31, %v1325_v22  ;;  %v2840_v63 = vshrl.u32 %v1254_v62, 30  ;;  %v2847_v39 = vsel %vm598_vm11, %v680_v2, %v679_v48  ;;  %v890_v25 = vadd.s32 %v2617_v13, %v2625_v19 }
 0x1ee   : > { %v2853_v43 = vor.u32 %v789_v32, %v788_v18  ;;  %v2855_v46 = vor.u32 4788187, %v793_v17  ;;  %v906_v26 = vsub.s32 32, %v2834_v28  ;;  %v911_v10 = vadd.s32 127, %v910_v53 }
 0x1ef   : > { %v1328_v40 = vsub.s32 32, %v1327_v0  ;;  %v1256_v34 = vshll.u32 %v2840_v63, 30  ;;  %v2858_v30 = vsel %vm1768_vm12, 0, %v1767_v33  ;;  %vm1775_vm13 = vcmp.lt.s32.totalorder %v1774_v31, 0 }
 0x1f0   : > { %v1320_v3 = vand.u32 8388607, %v3209_v54  ;;  %v2865_v13 = vshrl.u32 %v1325_v22, 5  ;;  %v1330_v19 = vshll.u32 %v2108_v59, %v1327_v0  ;;  %v1333_v15 = vshll.u32 %v2109_v61, %v1327_v0 }
 0x1f1   : > { %v2860_v21 = vsub.s32 %v1253_v51, %v1256_v34  ;;  %v1334_v48 = vshrl.u32 %v2110_v1, %v1328_v40  ;;  %v1331_v20 = vshrl.u32 %v2109_v61, %v1328_v40  ;;  %v1336_v56 = vshll.u32 %v2110_v1, %v1327_v0 }
 0x1f2   : > { %v1337_v14 = vshrl.u32 %v2111_v4, %v1328_v40  ;;  %v1339_v51 = vshll.u32 %v2111_v4, %v1327_v0  ;;  %v1340_v16 = vshrl.u32 %v2112_v7, %v1328_v40  ;;  %v1342_v33 = vshll.u32 %v2112_v7, %v1327_v0 }
 0x1f3   : > { %v1259_v45 = vsub.s32 0, %v2860_v21  ;;  %v1343_v2 = vshrl.u32 %v2113_v12, %v1328_v40  ;;  %v2877_v62 = vsel %vm1775_vm13, 0, %v1774_v31  ;;  %v1335_v32 = vor.u32 %v1334_v48, %v1333_v15 }
 0x1f4   : > { %v1338_v17 = vor.u32 %v1337_v14, %v1336_v56  ;;  %v1029_v61 = vsub.s32 4294967266, %v2858_v30  ;;  %v1332_v53 = vor.u32 %v1331_v20, %v1330_v19  ;;  %v1341_v1 = vor.u32 %v1340_v16, %v1339_v51 }
 0x1f5   : > { %v1780_v22 = vmin.u32 %v1259_v45, %v2860_v21  ;;  %v1344_v18 = vor.u32 %v1343_v2, %v1342_v33  ;;  %v907_v4 = vshll.u32 %v2767_v37, %v2834_v28  ;;  %v908_v34 = vshrl.u32 %v890_v25, %v906_v26 }
 0x1f6   : > { %v912_v54 = vshll.u32 %v911_v10, 23  ;;  %v1149_v7 = vsub.s32 4294967266, %v2877_v62  ;;  %v1321_v12 = vor.u32 8388608, %v1320_v3  ;;  %vm1345_vm14 = vcmp.lt.s32.totalorder %v2865_v13, 1 }
 0x1f7   : > { %v1261_v42 = vclz %v1780_v22  ;;  %vm1348_vm15 = vcmp.lt.s32.totalorder %v2865_v13, 4  ;;  %vm1347_vm1 = vcmp.lt.s32.totalorder %v2865_v13, 3  ;;  %v1357_v48 = vsel %vm1345_vm14, %v1335_v32, %v1338_v17 }
 0x1f8   : > { %v1354_v31 = vsel %vm1348_vm15, %v1341_v1, 920167782  ;;  %v1030_v19 = vadd.s32 127, %v1029_v61  ;;  %v1353_v37 = vsel %vm1345_vm14, %v1332_v53, %v1335_v32  ;;  %v1358_v25 = vsel %vm1348_vm15, %v1344_v18, 1326507024 }
 0x1f9   : > { %v1781_v0 = vadd.s32 4294967294, %v1261_v42  ;;  %v1355_v28 = vsel %vm1347_vm1, %v1338_v17, %v1354_v31  ;;  %v1025_v26 = vsub.s32 32, %v2858_v30  ;;  %vm1346_vm3 = vcmp.lt.s32.totalorder %v2865_v13, 2 }
 0x1fa   : > { %v1359_v42 = vsel %vm1347_vm1, %v1341_v1, %v1358_v25  ;;  %v1350_v3 = vsel %vm1348_vm15, %v1338_v17, 2102212464  ;;  %v1361_v45 = vshll.u32 %v1321_v12, 8  ;;  %v1150_v15 = vadd.s32 127, %v1149_v7 }
 0x1fb   : > { %vm1782_vm2 = vcmp.lt.s32.totalorder %v1781_v0, 0  ;;  %v1360_v20 = vsel %vm1346_vm3, %v1357_v48, %v1359_v42  ;;  %v1329_v14 = vshrl.u32 %v2108_v59, %v1328_v40  ;;  %v1356_v51 = vsel %vm1346_vm3, %v1353_v37, %v1355_v28 }
 0x1fc   : > { %v1264_v10 = vsel %vm1782_vm2, 0, %v1781_v0  ;;  %v1009_v16 = vadd.s32 %v2704_v44, %v2717_v55  ;;  %v1031_v33 = vshll.u32 %v1030_v19, 23  ;;  %v1145_v17 = vsub.s32 32, %v2877_v62 }
 0x1fd   : > { %v1269_v56 = vsub.s32 4294967266, %v1264_v10  ;;  %v2904_v2 = vmul.u32.u64.low %v1361_v45, %v1360_v20  ;;  %v2905_v22 = vmul.u32.u64.high %v1361_v45, %v1360_v20, %v2904_v2  ;;  %v1349_v1 = vsel %vm1345_vm14, %v1329_v14, %v1332_v53 }
 0x1fe   : > { %v1351_v18 = vsel %vm1347_vm1, %v1335_v32, %v1350_v3  ;;  %v913_v59 = vor.u32 4788187, %v912_v54  ;;  %v1027_v40 = vshrl.u32 %v1009_v16, %v1025_v26  ;;  %v795_v44 = vand.u32 2147483647, %v2855_v46 }
 0x1ff   : > { %v1270_v61 = vadd.s32 127, %v1269_v56  ;;  %v2912_v7 = vmul.u32.u64.low %v1361_v45, %v1356_v51  ;;  %v2913_v12 = vmul.u32.u64.high %v1361_v45, %v1356_v51, %v2912_v7  ;;  %v1129_v55 = vadd.s32 %v2753_v6, %v2760_v41 }
 0x200   : > { %v1151_v0 = vshll.u32 %v1150_v15, 23  ;;  %v1265_v31 = vsub.s32 32, %v1264_v10  ;;  %v909_v48 = vor.u32 %v908_v34, %v907_v4  ;;  %v1026_v53 = vshll.u32 %v2789_v29, %v2858_v30 }
 0x201   : > { %v1032_v19 = vor.u32 4788187, %v1031_v33  ;;  %v1352_v54 = vsel %vm1346_vm3, %v1349_v1, %v1351_v18  ;;  %v1147_v32 = vshrl.u32 %v1129_v55, %v1145_v17  ;;  %v1249_v37 = vadd.s32 %v2819_v23, %v2824_v57 }
 0x202   : > { %v1271_v28 = vshll.u32 %v1270_v61, 23  ;;  %vm1370_vm4 = vc.u32 %v2905_v22, %v2912_v7  ;;  %v797_v6 = vcvt.s32.f32 %v2853_v43  ;;  %v914_v41 = vand.u32 2147483647, %v913_v59 }
 0x203   : > { %v1028_v46 = vor.u32 %v1027_v40, %v1026_v53  ;;  %v1371_v4 = vadd.s32 1, %v2913_v12  ;;  %v1146_v29 = vshll.u32 %v2811_v5, %v2877_v62  ;;  %v1152_v30 = vor.u32 4788187, %v1151_v0 }
 0x204   : > { %v1267_v13 = vshrl.u32 %v1249_v37, %v1265_v31  ;;  %v1368_v34 = vmul.u32 %v1361_v45, %v1352_v54  ;;  %v798_v25 = vmul.f32 %v797_v6, %v795_v44  ;;  %v916_v26 = vcvt.s32.f32 %v909_v48 }
 0x205   : > { %v1033_v42 = vand.u32 2147483647, %v1032_v19  ;;  %v1372_v23 = vsel %vm1370_vm4, %v1371_v4, %v2913_v12  ;;  %v1148_v57 = vor.u32 %v1147_v32, %v1146_v29  ;;  %v1266_v3 = vshll.u32 %v2860_v21, %v1264_v10 }
 0x206   : > { %v1272_v20 = vor.u32 4788187, %v1271_v28  ;;  %v1373_v43 = vadd.s32 %v1372_v23, %v1368_v34  ;;  %v3221_v15 = vand.u32 2147483647, %v2330_v49  ;;  %v917_v5 = vmul.f32 %v916_v26, %v914_v41 }
 0x207   : > { %v1035_v62 = vcvt.s32.f32 %v1028_v46  ;;  %v1153_v14 = vand.u32 2147483647, %v1152_v30  ;;  %v1268_v45 = vor.u32 %v1267_v13, %v1266_v3  ;;  %v3224_v16 = vsub.s32 4, %v2602_v52 }
 0x208   : > { %vm2935_vm5 = vcmp.le.f32.partialorder %v3221_v15, 0.7853982  ;;  %v1374_v51 = vadd.s32 536870912, %v1373_v43  ;;  %v799_v10 = vxor.u32 2147483648, %v798_v25  ;;  %v1155_v17 = vcvt.s32.f32 %v1148_v57 }
 0x209   : > { %v683_v33 = vsel %vm598_vm11, %v3224_v16, %v2602_v52  ;;  %v684_v21 = vsel %vm2935_vm5, %v2330_v49, %v2847_v39  ;;  %v1036_v2 = vmul.f32 %v1035_v62, %v1033_v42  ;;  %v1273_v61 = vand.u32 2147483647, %v1272_v20 }
 0x20a   : > { %v2948_v1 = vshrl.u32 %v1374_v51, 30  ;;  %v801_v18 = vsub.s32 4, %v2689_v50  ;;  %v918_v59 = vxor.u32 2147483648, %v917_v5  ;;  %v1156_v40 = vmul.f32 %v1155_v17, %v1153_v14 }
 0x20b   : > { %v1275_v12 = vcvt.s32.f32 %v1268_v45  ;;  %v685_v52 = vsel %vm2935_vm5, 0, %v683_v33  ;;  %1952 = vcosq.f32 %v684_v21  ;;  %vm717_vm6 = vcmp.lt.s32.totalorder %v2360_v47, 0 }
 0x20c   : > { %v1376_v44 = vshll.u32 %v2948_v1, 30  ;;  %v800_v39 = vsel %vm717_vm6, %v799_v10, %v798_v25  ;;  %v1037_v55 = vxor.u32 2147483648, %v1036_v2  ;;  %v3225_v48 = vand.u32 2147483647, %v2360_v47 }
 0x20d   : > { %v1276_v0 = vmul.f32 %v1275_v12, %v1273_v61  ;;  %v802_v19 = vsel %vm717_vm6, %v801_v18, %v2689_v50  ;;  %vm836_vm8 = vcmp.lt.s32.totalorder %v2374_v11, 0  ;;  %v920_v54 = vsub.s32 4, %v2738_v9 }
 0x20e   : > { %v2955_v31 = vsub.s32 %v1373_v43, %v1376_v44  ;;  %vm2959_vm7 = vcmp.le.f32.partialorder %v3225_v48, 0.7853982  ;;  %1954 = vsinq.f32 %v684_v21  ;;  %v919_v32 = vsel %vm836_vm8, %v918_v59, %v917_v5 }
 0x20f   : > { %v1157_v37 = vxor.u32 2147483648, %v1156_v40  ;;  %v689_v6 = vadd.s32 3, %v685_v52  ;;  %v803_v41 = vsel %vm2959_vm7, %v2360_v47, %v800_v39  ;;  %v3228_v46 = vand.u32 2147483647, %v2374_v11 }
 0x210   : > { %v1379_v28 = vsub.s32 0, %v2955_v31  ;;  %vm955_vm10 = vcmp.lt.s32.totalorder %v2515_v24, 0  ;;  %v804_v50 = vsel %vm2959_vm7, 0, %v802_v19  ;;  %v1277_v30 = vxor.u32 2147483648, %v1276_v0 }
 0x211   : > { %vm2972_vm9 = vcmp.le.f32.partialorder %v3228_v46, 0.7853982  ;;  %v1038_v29 = vsel %vm955_vm10, %v1037_v55, %v1036_v2  ;;  %v921_v34 = vsel %vm836_vm8, %v920_v54, %v2738_v9  ;;  %v3231_v26 = vand.u32 2147483647, %v2515_v24 }
 0x212   : > { %v1787_v13 = vmin.u32 %v1379_v28, %v2955_v31  ;;  %v922_v25 = vsel %vm2972_vm9, %v2374_v11, %v919_v32  ;;  %vm1075_vm12 = vcmp.lt.s32.totalorder %v2595_v36, 0  ;;  %1956 = vcosq.f32 %v803_v41 }
 0x213   : > { %vm2988_vm11 = vcmp.le.f32.partialorder %v3231_v26, 0.7853982  ;;  %v1039_v23 = vsub.s32 4, %v2775_v38  ;;  %v1158_v57 = vsel %vm1075_vm12, %v1157_v37, %v1156_v40  ;;  %v2996_v9 = vand.u32 3, %v689_v6 }
 0x214   : > { %v1381_v3 = vclz %v1787_v13  ;;  %1958 = vsinq.f32 %v803_v41  ;;  %v1041_v20 = vsel %vm2988_vm11, %v2515_v24, %v1038_v29  ;;  %vm1195_vm13 = vcmp.lt.s32.totalorder %v2711_v60, 0 }
 0x215   : > { %1960 = vcosq.f32 %v922_v25  ;;  %v3234_v43 = vand.u32 2147483647, %v2595_v36  ;;  %v1278_v56 = vsel %vm1195_vm13, %v1277_v30, %v1276_v0  ;;  %v1953_v62 = vpop.eup %1952  ;;  %v808_v14 = vadd.s32 3, %v804_v50 }
 0x216   : > { %v1788_v5 = vadd.s32 4294967294, %v1381_v3  ;;  %v923_v45 = vsel %vm2972_vm9, 0, %v921_v34  ;;  %1962 = vsinq.f32 %v922_v25  ;;  %v1040_v16 = vsel %vm955_vm10, %v1039_v23, %v2775_v38 }
 0x217   : > { %vm3004_vm14 = vcmp.le.f32.partialorder %v3234_v43, 0.7853982  ;;  %1964 = vcosq.f32 %v1041_v20  ;;  %v3237_v33 = vand.u32 2147483647, %v2711_v60  ;;  %v1159_v10 = vsub.s32 4, %v2784_v35 }
 0x218   : > { %v1161_v51 = vsel %vm3004_vm14, %v2595_v36, %v1158_v57  ;;  %vm1789_vm1 = vcmp.lt.s32.totalorder %v1788_v5, 0  ;;  %1966 = vsinq.f32 %v1041_v20  ;;  %v1955_v61 = vpop.eup %1954  ;;  %v1369_v38 = vadd.s32 %v2912_v7, %v2905_v22 }
 0x219   : > { %vm3020_vm15 = vcmp.le.f32.partialorder %v3237_v33, 0.7853982  ;;  %v1384_v17 = vsel %vm1789_vm1, 0, %v1788_v5  ;;  %1968 = vcosq.f32 %v1161_v51  ;;  %v696_v40 = vxor.u32 2147483648, %v1953_v62 }
 0x21a   : > { %v1281_v2 = vsel %vm3020_vm15, %v2711_v60, %v1278_v56  ;;  %v1385_v18 = vsub.s32 32, %v1384_v17  ;;  %v1389_v59 = vsub.s32 4294967266, %v1384_v17  ;;  %v1042_v12 = vsel %vm2988_vm11, 0, %v1040_v16 }
 0x21b   : > { %1970 = vsinq.f32 %v1161_v51  ;;  %v1279_v44 = vsub.s32 4, %v2840_v63  ;;  %v1386_v52 = vshll.u32 %v2955_v31, %v1384_v17  ;;  %v693_v0 = vxor.u32 2147483648, %v1955_v61 }
 0x21c   : > { %1972 = vcosq.f32 %v1281_v2  ;;  %v1387_v39 = vshrl.u32 %v1369_v38, %v1385_v18  ;;  %v1390_v55 = vadd.s32 127, %v1389_v59  ;;  %v927_v48 = vadd.s32 3, %v923_v45  ;;  %v3037_v7 = vpop.eup %1956 }
 0x21d   : > { %v1160_v22 = vsel %vm1075_vm12, %v1159_v10, %v2784_v35  ;;  %1974 = vsinq.f32 %v1281_v2  ;;  %v1046_v53 = vadd.s32 3, %v1042_v12  ;;  %vm692_vm2 = vcmp.eq.s32.totalorder %v2996_v9, 0 }
 0x21e   : > { %v1388_v19 = vor.u32 %v1387_v39, %v1386_v52  ;;  %v1391_v54 = vshll.u32 %v1390_v55, 23  ;;  %v3039_v32 = vpop.eup %1958  ;;  %v1280_v31 = vsel %vm1195_vm13, %v1279_v44, %v2840_v63  ;;  %vm695_vm3 = vcmp.eq.s32.totalorder %v2996_v9, 2 }
 0x21f   : > { %v3045_v37 = vpop.eup %1960  ;;  %v3048_v28 = vand.u32 3, %v808_v14  ;;  %v1162_v35 = vsel %vm3004_vm14, 0, %v1160_v22  ;;  %v694_v46 = vsel %vm692_vm2, %v1953_v62, %v693_v0  ;;  %v697_v4 = vsel %vm695_vm3, %v696_v40, %v1955_v61 }
 0x220   : > { %v1392_v6 = vor.u32 4788187, %v1391_v54  ;;  %v3052_v41 = vpop.eup %1962  ;;  %v815_v50 = vxor.u32 2147483648, %v3037_v7  ;;  %v3055_v29 = vand.u32 3, %v927_v48  ;;  %v1047_v63 = vand.u32 3, %v1046_v53 }
 0x221   : > { %v1965_v30 = vpop.eup %1964  ;;  %v1282_v13 = vsel %vm3020_vm15, 0, %v1280_v31  ;;  %v1395_v25 = vcvt.s32.f32 %v1388_v19  ;;  %v1166_v42 = vadd.s32 3, %v1162_v35  ;;  %vm691_vm4 = vcmp.lt.s32.totalorder %v2996_v9, 2 }
 0x222   : > { %v1393_v34 = vand.u32 2147483647, %v1392_v6  ;;  %v1967_v26 = vpop.eup %1966  ;;  %vm811_vm5 = vcmp.eq.s32.totalorder %v3048_v28, 0  ;;  %v1399_v3 = vsub.s32 4, %v2948_v1  ;;  %v698_v43 = vsel %vm691_vm4, %v694_v46, %v697_v4 }
 0x223   : > { %v1969_v23 = vpop.eup %1968  ;;  %v812_v15 = vxor.u32 2147483648, %v3039_v32  ;;  %vm814_vm6 = vcmp.eq.s32.totalorder %v3048_v28, 2  ;;  %v1286_v56 = vadd.s32 3, %v1282_v13  ;;  %vm930_vm7 = vcmp.eq.s32.totalorder %v3055_v29, 0 }
 0x224   : > { %v1396_v57 = vmul.f32 %v1395_v25, %v1393_v34  ;;  %v816_v62 = vsel %vm814_vm6, %v815_v50, %v3039_v32  ;;  %vm933_vm8 = vcmp.eq.s32.totalorder %v3055_v29, 2  ;;  %vm1049_vm9 = vcmp.eq.s32.totalorder %v1047_v63, 0  ;;  %v1783_v25 = vld [vmem:[%s3192_s2 + $0x6] ss:$0 sm:$0xff] }
 0x225   : > { %v1971_v20 = vpop.eup %1970  ;;  %vm1315_vm10 = vcmp.lt.s32.totalorder %v2808_v27, 0  ;;  %vm688_vm11 = vweird.f32 %v2330_v49  ;;  %v1050_v45 = vxor.u32 2147483648, %v1967_v26  ;;  %v1053_v51 = vxor.u32 2147483648, %v1965_v30 }
 0x226   : > { %v1973_v5 = vpop.eup %1972  ;;  %v1397_v9 = vxor.u32 2147483648, %v1396_v57  ;;  %v1167_v16 = vand.u32 3, %v1166_v42  ;;  %v3240_v33 = vand.u32 2147483647, %v2808_v27  ;;  %v1170_v10 = vxor.u32 2147483648, %v1971_v20 }
 0x227   : > { %v1975_v14 = vpop.eup %1974  ;;  %v1173_v2 = vxor.u32 2147483648, %v1969_v23  ;;  %v1400_v61 = vsel %vm1315_vm10, %v1399_v3, %v2948_v1  ;;  %v934_v38 = vxor.u32 2147483648, %v3045_v37  ;;  %vm1052_vm13 = vcmp.eq.s32.totalorder %v1047_v63, 2 }
 0x228   : > { %vm3071_vm12 = vcmp.le.f32.partialorder %v3240_v33, 0.7853982  ;;  %v1398_v17 = vsel %vm1315_vm10, %v1397_v9, %v1396_v57  ;;  %v1287_v18 = vand.u32 3, %v1286_v56  ;;  %v931_v40 = vxor.u32 2147483648, %v3052_v41  ;;  %v1790_v56 = vld [vmem:[%s3192_s2 + $0x7] ss:$0 sm:$0xff] }
 0x229   : > { %v1401_v59 = vsel %vm3071_vm12, %v2808_v27, %v1398_v17  ;;  %v1290_v12 = vxor.u32 2147483648, %v1975_v14  ;;  %v1293_v44 = vxor.u32 2147483648, %v1973_v5  ;;  %vm1169_vm14 = vcmp.eq.s32.totalorder %v1167_v16, 0 }
 0x22a   : > { %1976 = vcosq.f32 %v1401_v59  ;;  %vm1172_vm15 = vcmp.eq.s32.totalorder %v1167_v16, 2  ;;  %v1402_v52 = vsel %vm3071_vm12, 0, %v1400_v61  ;;  %v1051_v1 = vsel %vm1049_vm9, %v1965_v30, %v1050_v45 }
 0x22b   : > { %1978 = vsinq.f32 %v1401_v59  ;;  %v1054_v39 = vsel %vm1052_vm13, %v1053_v51, %v1967_v26  ;;  %v1171_v55 = vsel %vm1169_vm14, %v1969_v23, %v1170_v10  ;;  %v1174_v0 = vsel %vm1172_vm15, %v1173_v2, %v1971_v20 }
 0x22c   : > { %v813_v48 = vsel %vm811_vm5, %v3037_v7, %v812_v15  ;;  %vm1048_vm1 = vcmp.lt.s32.totalorder %v1047_v63, 2  ;;  %vm1289_vm2 = vcmp.eq.s32.totalorder %v1287_v18, 0  ;;  %vm1292_vm3 = vcmp.eq.s32.totalorder %v1287_v18, 2  ;;  %v1741_v7 = vld [vmem:[%s3192_s2] ss:$0 sm:$0xff] }
 0x22d   : > { %vm1168_vm4 = vcmp.lt.s32.totalorder %v1167_v16, 2  ;;  %v1291_v22 = vsel %vm1289_vm2, %v1973_v5, %v1290_v12  ;;  %v1294_v53 = vsel %vm1292_vm3, %v1293_v44, %v1975_v14  ;;  %v1406_v19 = vadd.s32 3, %v1402_v52 }
 0x22e   : > { %v932_v54 = vsel %vm930_vm7, %v3045_v37, %v931_v40  ;;  %v935_v32 = vsel %vm933_vm8, %v934_v38, %v3052_v41  ;;  %v1055_v31 = vsel %vm1048_vm1, %v1051_v1, %v1054_v39  ;;  %v1175_v35 = vsel %vm1168_vm4, %v1171_v55, %v1174_v0  ;;  %v1748_v37 = vld [vmem:[%s3192_s2 + $0x1] ss:$0 sm:$0xff]  ;;  %v1769_v41 = vld [vmem:[%s3192_s2 + $0x4] ss:$0 sm:$0xff] }
 0x22f   : > { %v699_v6 = vsel %vm688_vm11, nan, %v698_v43  ;;  %vm810_vm5 = vcmp.lt.s32.totalorder %v3048_v28, 2  ;;  %vm1045_vm6 = vweird.f32 %v2515_v24  ;;  %vm1288_vm9 = vcmp.lt.s32.totalorder %v1287_v18, 2  ;;  %v1776_v24 = vld [vmem:[%s3192_s2 + $0x5] ss:$0 sm:$0xff] }
 0x230   : > { %v817_v46 = vsel %vm810_vm5, %v813_v48, %v816_v62  ;;  %vm929_vm7 = vcmp.lt.s32.totalorder %v3055_v29, 2  ;;  %vm1165_vm8 = vweird.f32 %v2595_v36  ;;  %v1295_v49 = vsel %vm1288_vm9, %v1291_v22, %v1294_v53  ;;  %v1755_v36 = vld [vmem:[%s3192_s2 + $0x2] ss:$0 sm:$0xff] }
 0x231   : > { %v936_v4 = vsel %vm929_vm7, %v932_v54, %v935_v32  ;;  %v1056_v50 = vsel %vm1045_vm6, nan, %v1055_v31  ;;  %v1176_v28 = vsel %vm1165_vm8, nan, %v1175_v35  ;;  %v1407_v30 = vand.u32 3, %v1406_v19  ;;  %v1455_v53 = vld [vmem:[%s389_s19] sm:$0xf]  ;;  %s2031_s19 = scalar_lea.vmem %s2030_s15, 512 }
 0x232   : > { %vm807_vm10 = vweird.f32 %v2360_v47  ;;  %vm926_vm11 = vweird.f32 %v2374_v11  ;;  %vm1285_vm12 = vweird.f32 %v2711_v60  ;;  %v585_v63 = vmul.f32 %v1741_v7, %v2548_v58  ;;  %v1762_v47 = vld [vmem:[%s3192_s2 + $0x3] ss:$0 sm:$0xff]  ;;  %v1932_v54 = vld [vmem:[#allocation7 + $0x4] ss:$8 sps:$4 sm:$0xff]   ;;  %v1935_v31 = vld [vmem:[#allocation7 + $0x14] ss:$8 sps:$4 sm:$0xff]  }
 0x233   : > { %v704_v13 = vmul.f32 %v1748_v37, %v699_v6  ;;  %v818_v34 = vsel %vm807_vm10, nan, %v817_v46  ;;  %v1296_v26 = vsel %vm1285_vm12, nan, %v1295_v49  ;;  %v937_v11 = vsel %vm926_vm11, nan, %v936_v4  ;;  %v1934_v32 = vld [vmem:[#allocation7] ss:$8 sps:$4 sm:$0xff]   ;;  %1559 = vmatprep.subr.bf16.mxu1 %v1932_v54 }
 0x234   : > { %v1977_v29 = vpop.eup %1976  ;;  %v1061_v60 = vmul.f32 %v1769_v41, %v1056_v50  ;;  %v1181_v23 = vmul.f32 %v1776_v24, %v1176_v28  ;;  %vm1412_vm13 = vcmp.eq.s32.totalorder %v1407_v30, 2  ;;  %v823_v3 = vmul.f32 %v1755_v36, %v818_v34  ;;  %1560 = vmatpush1.bf16.msra.mxu1 %v1934_v32  ;;  %v1937_v35 = vld [vmem:[#allocation7 + $0x10] ss:$8 sps:$4 sm:$0xff]   ;;  %v1938_v7 = vld [vmem:[#allocation7 + $0x24] ss:$8 sps:$4 sm:$0xff]  }
 0x235   : > { %v1979_v42 = vpop.eup %1978  ;;  %v1413_v58 = vxor.u32 2147483648, %v1977_v29  ;;  %v1301_v20 = vmul.f32 %v1783_v25, %v1296_v26  ;;  %vm1409_vm14 = vcmp.eq.s32.totalorder %v1407_v30, 0  ;;  %v942_v15 = vmul.f32 %v1762_v47, %v937_v11  ;;  %1561 = vmatprep.subr.bf16.mxu1 %v1935_v31  ;;  %v1940_v6 = vld [vmem:[#allocation7 + $0x20] ss:$8 sps:$4 sm:$0xff]   ;;  %v1941_v37 = vld [vmem:[#allocation7 + $0x34] ss:$8 sps:$4 sm:$0xff]  }
 0x236   : > { %v1410_v57 = vxor.u32 2147483648, %v1979_v42  ;;  %vm1408_vm15 = vcmp.lt.s32.totalorder %v1407_v30, 2  ;;  %v1062_v62 = vadd.f32 %v1061_v60, %v585_v63  ;;  %v1182_v9 = vadd.f32 %v1181_v23, %v704_v13  ;;  %v1943_v50 = vld [vmem:[#allocation7 + $0x30] ss:$8 sps:$4 sm:$0xff]   ;;  %v399_v13 = vld [vmem:[%s3198_s8] sm:$0x3] }
 0x237   : > { %v1414_v43 = vsel %vm1412_vm13, %v1413_v58, %v1979_v42  ;;  %vm1405_vm1 = vweird.f32 %v2808_v27  ;;  %v1302_v51 = vadd.f32 %v1301_v20, %v823_v3  ;;  %v1440_v18 = vstv %s1439_s28  ;;  %s2025_s28 = scalar_lea.vmem %s3150_s25, 256 }
 0x238   : > { %v1411_v5 = vsel %vm1409_vm14, %v1977_v29, %v1410_v57  ;;  %v1423_v21 = vadd.f32 %v1182_v9, %v1062_v62  ;;  %vm1459_vm2 = vcmask 1043456   ;;  %v2117_v22 = vmov 0.0   ;;  %1562 = vmatpush1.bf16.msra.mxu1 %v1937_v35  ;;  %p2026_p9 = scmp.ne.s32.totalorder %s3150_s25, %s2025_s28  ;;  %p2033_p3 = scmp.lt.s32.totalorder %s2031_s19, %s2025_s28 }
 0x239   : > { %v1415_v14 = vsel %vm1408_vm15, %v1411_v5, %v1414_v43  ;;  %1809 = vmatprep.subr.bf16.mxu0 %v2117_v22  ;;  %vm2118_vm3 = vmmov 0   ;;  %v1461_v19 = vsel %vm1459_vm2, %v1455_v53, 0  ;;  %1563 = vmatprep.subr.bf16.mxu1 %v1938_v7  ;;  %vm1555_vm4 = vcmask 523264  }
 0x23a   : > { %v1416_v45 = vsel %vm1405_vm1, nan, %v1415_v14  ;;  %1811 = vmatprep.mubr.msk.bf16.mxu0 %vm2118_vm3, %v2117_v22  ;;  %1810 = vmatpush3.bf16.msra.mxu0 %v1461_v19  ;;  %v3243_v36 = vsub.s32 0, %v2304_v8  ;;  %v3244_v25 = vsub.s32 1, %v2304_v8  ;;  %p2027_p12 = pnand %p2026_p9, %p2211_p5  ;;  %p2034_p4 = por %p2033_p3, %p2032_p2 }
 0x23b   : > { %v1421_v16 = vmul.f32 %v1790_v56, %v1416_v45 }
 0x23c   : > { %1564 = vmatpush1.bf16.msra.mxu1 %v1940_v6  ;;  %v1508_v34 = vrot.slane %v399_v13, %v3243_v36  ;;  %v1512_v26 = vrot.slane %v399_v13, %v3244_v25  ;;  %p2028_p1 = pneg %p2027_p12 }
 0x23d   : > { %v1422_v33 = vadd.f32 %v1421_v16, %v942_v15  ;;  %1565 = vmatprep.subr.bf16.mxu1 %v1941_v37 }
 0x23e   : > { %p2035_p7 = pnand %p2034_p4, %p2028_p1 }
 0x23f   : > { %v1424_v10 = vadd.f32 %v1422_v33, %v1302_v51 }
 0x240   : > { %1566 = vmatpush1.bf16.msra.mxu1 %v1943_v50 }
 0x241   : > { %v1425_v2 = vadd.f32 %v1424_v10, %v1423_v21 }
 0x243   : > { %1431 = vrot.lane.b32.xlu1 %v1425_v2, %s2114_s26  ;;  %1427 = vrot.lane.b32.xlu0 %v1425_v2, %s2115_s27 }
 0x247   : > { %1435 = vrot.lane.b32.xlu0 %v1425_v2, %s2116_s30  ;;  %s3148_s30 = scalar_lea.hbm %s3199_s9, %s1806_s23 }
 0x2b5   : > { %v1428_v17 = vpop.permute.xlu0 %1427  ;;  %v1432_v38 = vpop.permute.xlu1 %1431 }
 0x2b6   : > { %v1430_v61 = vadd.f32 %v1428_v17, %v1425_v2 }
 0x2b8   : > { %v1434_v27 = vadd.f32 %v1432_v38, %v1430_v61 }
 0x2b9   : > { %v1436_v59 = vpop.permute.xlu0 %1435 }
 0x2ba   : > { %v1438_v40 = vadd.f32 %v1436_v59, %v1434_v27 }
 0x2bc   : > { %v1441_v12 = vadd.f32 %v1440_v18, %v1438_v40 }
 0x2be   : > { %v1442_v44 = vmax.f32 %v1441_v12, 0.0 }
 0x2c0   : > { %v1443_v52 = vsel %vm458_vm0, %v1442_v44, -inf }
 0x2c1   : > { %1444 = vmax.xlane.f32.xlu1 %v1443_v52 }
 0x34e   : > { %v1445_v1 = vpop.xlane.xlu1 %1444 }
 0x34f   : > { %v1446_v39 = vsub.f32 %v1442_v44, %v1445_v1 }
 0x351   : > { %v1447_v55 = vmul.f32 1.442695, %v1446_v39 }
 0x353   : > { %1980 = vpow2.f32 %v1447_v55 }
 0x35d   : > { %v1981_v0 = vpop.eup %1980 }
 0x35e   : > { %v1449_v48 = vsel %vm458_vm0, %v1981_v0, 0.0 }
 0x35f   : > { %1450 = vadd.xlane.f32.xlu0 %v1449_v48 }
 0x3ec   : > { %v1451_v46 = vpop.xlane.xlu0 %1450 }
 0x3ed   : > { %1982 = vrcp.f32 %v1451_v46 }
 0x3f7   : > { %v1983_v41 = vpop.eup %1982 }
 0x3f8   : > { %v1453_v49 = vmul.f32 %v1983_v41, %v1981_v0 }
 0x3fa   : > { %v1454_v4 = vpack.c.bf16 %v1453_v49, %v1453_v49 }
 0x3fc   : > { %1812 = vmatmul.mubr.msk.bf16.vlgmr.msra.gmra.mrb[0].mxu0 %vm458_vm0, %v1454_v4 }
 0x4cf   : > { %v1497_v24 = vpop.f32.mrb[0].mxu0 }
 0x4d0   : > { %v1503_v28 = vpack.c.bf16 %v1497_v24, %v1497_v24  ;;  %v1813_v30 = vpop.f32.mrb[1].mxu0 }
 0x4d1   : > { %v1500_v29 = vpop.f32.mrb[2].mxu0 }
 0x4d2   : > { %v1814_v63 = vpop.f32.mrb[3].mxu0  ;;  %1800 = vmatmul.mubr.msk.bf16.vlgmr.msra.gmra.mrb[0].mxu1 %vm1555_vm4, %v1503_v28 }
 0x5a5   : > { %v1593_v42 = vpop.f32.mrb[0].mxu1 }
 0x5a6   : > { %v1594_v47 = vadd.f32 %v1593_v42, %v1508_v34  ;;  %v1595_v11 = vpop.f32.mrb[1].mxu1 }
 0x5a7   : > { %v1596_v60 = vadd.f32 %v1595_v11, %v1512_v26  ;;  %v1597_v23 = vpop.f32.mrb[2].mxu1 }
 0x5a8   : > { %1600 = vst [vmem:[%s377_s24] sm:$0xff] %v1594_v47  ;;  %v1598_v8 = vpop.f32.mrb[3].mxu1 }
 0x5a9   : > { %1601 = vst [vmem:[%s377_s24 + $0x8] sm:$0xff] %v1596_v60 }
 0x5aa   : > { %2038 = shalt.err (!%p2035_p7)
}
 0x5ab   : > { %s2039_s22 = scalar_lea.hbm %s3148_s30, 256  ;;  %s2043_s18 = scalar_lea.hbm %s3199_s9, 512 }
 0x5ac   : > { %p2040_p8 = scmp.ne.s32.totalorder %s3148_s30, %s2039_s22  ;;  %p2044_p6 = scmp.lt.u32.totalorder %s3148_s30, %s3199_s9 }
 0x5ad   : > { %p2045_p10 = scmp.lt.u32.totalorder %s2043_s18, %s2039_s22  ;;  %p2047_p9 = scmp.lt.u32.totalorder %s2039_s22, %s3148_s30 }
 0x5ae   : > { %p2041_p0 = pnand %p2040_p8, %p2211_p5 }
 0x5af   : > { %p2046_p13 = por %p2045_p10, %p2044_p6 }
 0x5b0   : > { %p2042_p11 = pneg %p2041_p0 }
 0x5b1   : > { %p2048_p12 = por %p2047_p9, %p2046_p13 }
 0x5b3   : > { %p2049_p1 = pnand %p2048_p12, %p2042_p11 }
 0x5b5   : > { %2052 = shalt.err (!%p2049_p1)
}
 0x5b6   : > { %1855 = dma.vmem_to_hbm [thread:$0]  (%p2211_p5), %s3150_s25, 256, %s3148_s30, %s1603_s1  }
 0x5b7 PF: > { %p1872_p2 = scmp.ge.s32.totalorder %s2095_s14, 2  ;;  %s1629_s26 = sand.u32 1, %s2083_s11  }
 0x5b8   : > { %p3245_p3 = scmp.ne.s32.totalorder %s3212_s21, 0  ;;  %s1630_s27 = scalar_lea.sflag [#allocation5], %s1629_s26 }
 0x5ba   : > { %p1865_p4 = pnand %p1872_p2, %p3245_p3 }
 0x5bc   : > { %2078 = dma.done.wait (!%p1865_p4), %s1630_s27, 256  }
 0x5bd   : > { %2080 = vsyncadd (!%p1865_p4), %s1630_s27, 4294967040  ;;  %s3246_s28 = sld [smem:[#allocation12_spill]]  ;;  %p22_p7 = scmp.ge.s32.totalorder %s2198_s16, 4  }
 0x5be   : > { %s3247_s11 = smov %s2087_s12  ;;  %s3248_s12 = smov %s2091_s13 }
 0x5bf   : > { %s3250_s14 = smov %s2198_s16  ;;  %24 = sbr.rel (!%p22_p7) target bundleno = 7 (0x7), region = 107 }
 0x5c3   : > { %s3249_s13 = smov %s3246_s28 }
 0x5c6   :  { %1635 = vsyncpa [#allocation4], 1 }
 0x5c7   :  { %1637 = vsyncpa [#allocation4 + $0x1], 1 }
 0x5c8   :  { %1638 = vsyncpa [#allocation5], 1 }
 0x5c9   :  { %1640 = vsyncpa [#allocation5 + $0x1], 1 }
 0x5ca   :  { %1641 = vsyncpa [#allocation6], 1 }
 0x5cb   :  { %1643 = vsyncpa [#allocation6 + $0x1], 1 }

</bundles_post_ra>
